<compile_context>
chip_gen: v6e
topology: v6e:2x2x1
jax: 0.10.0
libtpu: 0.0.40
codegen_flags: <defaults>
</compile_context>

<pallas_src>
import functools
import math

import jax
import jax.numpy as jnp
from jax import lax
from jax.experimental import pallas as pl
from jax.experimental.pallas import tpu as pltpu


# Matmul input dtype.  Keep f32 for exact parity with the PyTorch reference;
# set to jnp.bfloat16 on v6e/v7x for ~2x MXU throughput and half the weight
# DMA bytes (accumulation stays f32 via preferred_element_type).
_MATMUL_DTYPE = jnp.float32


# ----------------------------- in-kernel helpers -----------------------------

def _mm(a, b):
    return jnp.dot(a.astype(_MATMUL_DTYPE), b.astype(_MATMUL_DTYPE),
                   preferred_element_type=jnp.float32)


def _qk(a, b):
    # a: [q, d], b: [k, d] -> [q, k]  (contraction over the last dim of both)
    return jnp.einsum('qd,kd->qk', a.astype(_MATMUL_DTYPE),
                      b.astype(_MATMUL_DTYPE),
                      preferred_element_type=jnp.float32)


def _layer_norm(x, g, b, eps=1e-5):
    # torch.nn.LayerNorm semantics: biased variance over last dim, eps=1e-5.
    mu = jnp.mean(x, axis=-1, keepdims=True)
    xc = x - mu
    var = jnp.mean(xc * xc, axis=-1, keepdims=True)
    return xc * lax.rsqrt(var + eps) * g + b


def _erf(x):
    # Abramowitz & Stegun 7.1.26 polynomial (|err| < 1.5e-7): f32-accurate
    # stand-in for the exact erf used by torch.nn.GELU().
    a1, a2, a3, a4, a5 = (0.254829592, -0.284496736, 1.421413741,
                          -1.453152027, 1.061405429)
    p = 0.3275911
    s = jnp.where(x >= 0.0, 1.0, -1.0)
    ax = jnp.abs(x)
    t = 1.0 / (1.0 + p * ax)
    poly = ((((a5 * t + a4) * t + a3) * t + a2) * t + a1) * t
    return s * (1.0 - poly * jnp.exp(-ax * ax))


def _gelu(x):
    return 0.5 * x * (1.0 + _erf(x * (1.0 / math.sqrt(2.0))))


def _softmax_last(x):
    m = jnp.max(x, axis=-1, keepdims=True)
    e = jnp.exp(x - m)
    return e * pl.reciprocal(jnp.sum(e, axis=-1, keepdims=True), approx=True)


# ------------------------------ the fused kernel ------------------------------

def _vit_kernel(num_heads, seq_valid,
                patches_ref, in_w_ref, addvec_ref,
                wqkv_ref, bqkv_ref, wo_ref, vecd_ref, w1_ref, b1_ref, w2_ref,
                hg_ref, hb_ref, hw_ref, hbias_ref,
                out_ref, x_scr):
    """Grid = (batch, layer).  x_scr holds this sample's activation in VMEM."""
    l = pl.program_id(1)
    n_layers = pl.num_programs(1)
    S_pad, D = x_scr.shape
    hd = D // num_heads
    scale = 1.0 / math.sqrt(hd)

    # -------- patch embedding + CLS token + positional embedding (l == 0) ----
    # patches rows: row 0 (CLS slot) and padded rows are zero, so the matmul
    # contributes nothing there; add_vec carries cls+pos[0] / pos+in_b / 0.
    @pl.when(l == 0)
    def _():
        patches = patches_ref[0]                               # (S_pad, in_dim)
        x_scr[...] = _mm(patches, in_w_ref[...]) + addvec_ref[...]

    x = x_scr[...]                                             # (S_pad, D)

    # ----------------------- pre-LN multi-head attention ---------------------
    vec = vecd_ref[0]                      # (6, D): ln1_g, ln1_b, ln2_g, ln2_b, bo, b2
    ln1_g, ln1_b = vec[0:1], vec[1:2]
    ln2_g, ln2_b = vec[2:3], vec[3:4]
    bo, b2 = vec[4:5], vec[5:6]

    h = _layer_norm(x, ln1_g, ln1_b)
    qkv = _mm(h, wqkv_ref[0]) + bqkv_ref[0]                    # (S_pad, 3D)
    q = qkv[:, :D] * scale
    k = qkv[:, D:2 * D]
    v = qkv[:, 2 * D:]

    # mask out padded key positions (>= seq_valid)
    kidx = lax.broadcasted_iota(jnp.int32, (1, S_pad), 1)
    kbias = jnp.where(kidx < seq_valid, 0.0, -1e30)

    wo = wo_ref[0]                                             # (D, D)
    attn = jnp.zeros((S_pad, D), jnp.float32)
    for hh in range(num_heads):            # static, small unroll over heads
        lo = hh * hd
        qh, kh, vh = q[:, lo:lo + hd], k[:, lo:lo + hd], v[:, lo:lo + hd]
        s = _qk(qh, kh) + kbias                                # (S_pad, S_pad)
        p = _softmax_last(s)
        oh = _mm(p, vh)                                        # (S_pad, hd)
        # fold each head straight into the output projection (no concat):
        attn = attn + _mm(oh, wo[lo:lo + hd, :])               # (S_pad, D)
    x1 = x + attn + bo

    # ---------------------------------- MLP ----------------------------------
    h2 = _layer_norm(x1, ln2_g, ln2_b)
    h2 = _mm(h2, w1_ref[0]) + b1_ref[0]
    h2 = _gelu(h2)
    h2 = _mm(h2, w2_ref[0]) + b2
    x2 = x1 + h2
    x_scr[...] = x2

    # ------------------- classification head (last layer) --------------------
    @pl.when(l == n_layers - 1)
    def _():
        cls = x2[0:1, :]                                       # CLS token row
        hc = _layer_norm(cls, hg_ref[...], hb_ref[...])
        out_ref[0] = (_mm(hc, hw_ref[...]) + hbias_ref[...]).astype(out_ref.dtype)


# ------------------------------ pallas wrapper --------------------------------

def _pallas_vit(patches_pad, in_w, add_vec,
                w_qkv, b_qkv, wo, vec_d, w1, b1, w2,
                head_g, head_b, head_w, head_bias,
                *, num_heads, seq_valid):
    B, S_pad, in_dim = patches_pad.shape
    L, D, _ = w_qkv.shape
    hidden = w1.shape[2]
    C_pad = head_w.shape[1]

    def const_spec(a):
        nd = a.ndim
        return pl.BlockSpec(a.shape, lambda b, l: (0,) * nd)

    def layer_spec(a):
        tail = a.shape[1:]
        nz = len(tail)
        return pl.BlockSpec((1,) + tail, lambda b, l: (l,) + (0,) * nz)

    def batch_spec(a):
        tail = a.shape[1:]
        nz = len(tail)
        return pl.BlockSpec((1,) + tail, lambda b, l: (b,) + (0,) * nz)

    args = (patches_pad, in_w, add_vec,
            w_qkv, b_qkv, wo, vec_d, w1, b1, w2,
            head_g, head_b, head_w, head_bias)
    in_specs = [batch_spec(patches_pad),
                const_spec(in_w), const_spec(add_vec),
                layer_spec(w_qkv), layer_spec(b_qkv), layer_spec(wo),
                layer_spec(vec_d), layer_spec(w1), layer_spec(b1),
                layer_spec(w2),
                const_spec(head_g), const_spec(head_b),
                const_spec(head_w), const_spec(head_bias)]

    # advisory cost estimate for XLA's scheduler
    flops_layer = (2 * S_pad * D * 3 * D        # fused QKV projection
                   + 4 * S_pad * S_pad * D      # QK^T + P@V over all heads
                   + 2 * S_pad * D * D          # output projection
                   + 4 * S_pad * D * hidden)    # MLP
    flops = B * (2 * S_pad * in_dim * D + L * flops_layer + 2 * D * C_pad)
    transcendentals = B * L * (num_heads * S_pad * S_pad + S_pad * hidden)
    bytes_accessed = int(sum(int(a.size) * a.dtype.itemsize for a in args)
                         + B * C_pad * 4)

    kernel = functools.partial(_vit_kernel, num_heads, seq_valid)

    out = pl.pallas_call(
        kernel,
        out_shape=jax.ShapeDtypeStruct((B, 1, C_pad), jnp.float32),
        grid_spec=pltpu.PrefetchScalarGridSpec(
            num_scalar_prefetch=0,
            grid=(B, L),
            in_specs=in_specs,
            out_specs=pl.BlockSpec((1, 1, C_pad), lambda b, l: (b, 0, 0)),
            scratch_shapes=[pltpu.VMEM((S_pad, D), jnp.float32)]),
        compiler_params=pltpu.CompilerParams(
            dimension_semantics=("parallel", "arbitrary")),
        cost_estimate=pl.CostEstimate(flops=int(flops),
                                      transcendentals=int(transcendentals),
                                      bytes_accessed=bytes_accessed),
    )(*args)
    return out[:, 0, :]


# --------------------------- model glue (plain JAX) ---------------------------

def img_to_patch(x, patch_size):
    """x: [B, C, H, W] (NCHW, same as PyTorch) -> [B, T, C*p*p]."""
    B, C, H, W = x.shape
    p = patch_size
    x = x.reshape(B, C, H // p, p, W // p, p)
    x = jnp.transpose(x, (0, 2, 4, 1, 3, 5))      # [B, H/p, W/p, C, p, p]
    x = x.reshape(B, (H // p) * (W // p), C * p * p)
    return x


@functools.partial(jax.jit, static_argnames=('patch_size', 'num_heads'))
def vit_forward(params, x, *, patch_size, num_heads):
    patches = img_to_patch(x, patch_size)          # [B, T, C*p*p]
    B, T, in_dim = patches.shape
    D = params['in_w'].shape[1]
    S = T + 1                                      # +1 CLS token
    S_pad = ((S + 7) // 8) * 8                     # pad seq to sublane multiple

    # patches placed at rows 1..T; row 0 (CLS slot) and padded rows are zero
    patches_pad = jnp.zeros((B, S_pad, in_dim), jnp.float32)
    patches_pad = patches_pad.at[:, 1:S, :].set(patches.astype(jnp.float32))

    # additive vector:
    #   row 0        = cls + pos[0]
    #   rows 1..T    = pos + in_b   (input-layer bias folded in)
    #   padded rows  = 0
    add_vec = jnp.zeros((S_pad, D), jnp.float32)
    add_vec = add_vec.at[:S].set(params['pos_embedding'][0, :S])
    add_vec = add_vec.at[1:S].add(params['in_b'][0])
    add_vec = add_vec.at[0].add(params['cls_token'][0, 0])
    # dropout(p=0.0) / eval mode -> identity

    # stack per-layer weights along a leading L axis; fuse QKV; pack vectors
    layers = params['layers']
    w_qkv = jnp.stack([jnp.concatenate([lp['wq'], lp['wk'], lp['wv']], axis=1)
                       for lp in layers])                          # [L, D, 3D]
    b_qkv = jnp.stack([jnp.concatenate([lp['bq'], lp['bk'], lp['bv']], axis=1)
                       for lp in layers])                          # [L, 1, 3D]
    wo = jnp.stack([lp['wo'] for lp in layers])                    # [L, D, D]
    vec_d = jnp.stack([jnp.concatenate([lp['ln1_g'], lp['ln1_b'],
                                        lp['ln2_g'], lp['ln2_b'],
                                        lp['bo'], lp['b2']], axis=0)
                       for lp in layers])                          # [L, 6, D]
    w1 = jnp.stack([lp['w1'] for lp in layers])                    # [L, D, H]
    b1 = jnp.stack([lp['b1'] for lp in layers])                    # [L, 1, H]
    w2 = jnp.stack([lp['w2'] for lp in layers])                    # [L, H, D]

    # pad classifier output to a lane-dense 128-wide slab
    C = params['head_w'].shape[1]
    C_pad = ((C + 127) // 128) * 128
    head_w = jnp.zeros((D, C_pad), jnp.float32).at[:, :C].set(params['head_w'])
    head_bias = jnp.zeros((1, C_pad), jnp.float32).at[:, :C].set(params['head_b'])

    out_pad = _pallas_vit(patches_pad, params['in_w'], add_vec,
                          w_qkv, b_qkv, wo, vec_d, w1, b1, w2,
                          params['head_ln_g'], params['head_ln_b'],
                          head_w, head_bias,
                          num_heads=num_heads, seq_valid=S)
    return out_pad[:, :C]


# ------------------------------ deterministic init ----------------------------

def init_params(key, *, embed_dim, hidden_dim, num_channels, num_layers,
                num_classes, patch_size, num_patches):
    D = embed_dim
    in_dim = num_channels * patch_size ** 2

    def w(k, shape, scale=0.02):
        return (scale * jax.random.normal(k, shape)).astype(jnp.float32)

    keys = jax.random.split(key, 4 + num_layers)
    k_in, k_cls, k_pos, k_head = keys[0], keys[1], keys[2], keys[3]

    ki = jax.random.split(k_in, 2)
    kh = jax.random.split(k_head, 2)

    params = {
        'in_w': w(ki[0], (in_dim, D)),
        'in_b': w(ki[1], (1, D)),
        'cls_token': jax.random.normal(k_cls, (1, 1, D), jnp.float32),
        'pos_embedding': jax.random.normal(k_pos, (1, 1 + num_patches, D),
                                           jnp.float32),
        'head_ln_g': jnp.ones((1, D), jnp.float32),
        'head_ln_b': jnp.zeros((1, D), jnp.float32),
        'head_w': w(kh[0], (D, num_classes)),
        'head_b': w(kh[1], (1, num_classes)),
        'layers': [],
    }

    for li in range(num_layers):
        lk = jax.random.split(keys[4 + li], 10)
        params['layers'].append({
            'ln1_g': jnp.ones((1, D), jnp.float32),
            'ln1_b': jnp.zeros((1, D), jnp.float32),
            # wq/wk/wv are the (transposed) row-splits of torch's in_proj_weight
            'wq': w(lk[0], (D, D)), 'wk': w(lk[1], (D, D)), 'wv': w(lk[2], (D, D)),
            'bq': w(lk[3], (1, D)), 'bk': w(lk[4], (1, D)), 'bv': w(lk[5], (1, D)),
            'wo': w(lk[6], (D, D)), 'bo': w(lk[7], (1, D)),
            'ln2_g': jnp.ones((1, D), jnp.float32),
            'ln2_b': jnp.zeros((1, D), jnp.float32),
            'w1': w(lk[8], (D, hidden_dim)),
            'b1': jnp.zeros((1, hidden_dim), jnp.float32),
            'w2': w(lk[9], (hidden_dim, D)),
            'b2': jnp.zeros((1, D), jnp.float32),
        })
    return params


# ------------------------------------ main ------------------------------------

if __name__ == "__main__":
    embed_dim = 32
    hidden_dim = 64
    num_channels = 4
    num_heads = 4
    num_layers = 2
    num_classes = 10
    patch_size = 4
    B, H, W = 2, 16, 16
    num_patches = (H // patch_size) * (W // patch_size)   # 16

    key = jax.random.PRNGKey(0)
    kx, kp = jax.random.split(key)
    x = jax.random.normal(kx, (B, num_channels, H, W), jnp.float32)

    params = init_params(kp, embed_dim=embed_dim, hidden_dim=hidden_dim,
                         num_channels=num_channels, num_layers=num_layers,
                         num_classes=num_classes, patch_size=patch_size,
                         num_patches=num_patches)

    out = vit_forward(params, x, patch_size=patch_size, num_heads=num_heads)
    out = jax.block_until_ready(out)
    assert out.shape == (B, num_classes), out.shape
    print("KERNEL_OK")
</pallas_src>

<mosaic_0001>
module attributes {stable_mosaic.version = 11 : i64} {
  func.func @_vit_kernel(%arg0: i32, %arg1: i32, %arg2: memref<1x24x64xf32, #tpu.memory_space<vmem>>, %arg3: memref<64x32xf32, #tpu.memory_space<vmem>>, %arg4: memref<24x32xf32, #tpu.memory_space<vmem>>, %arg5: memref<1x32x96xf32, #tpu.memory_space<vmem>>, %arg6: memref<1x1x96xf32, #tpu.memory_space<vmem>>, %arg7: memref<1x32x32xf32, #tpu.memory_space<vmem>>, %arg8: memref<1x6x32xf32, #tpu.memory_space<vmem>>, %arg9: memref<1x32x64xf32, #tpu.memory_space<vmem>>, %arg10: memref<1x1x64xf32, #tpu.memory_space<vmem>>, %arg11: memref<1x64x32xf32, #tpu.memory_space<vmem>>, %arg12: memref<1x32xf32, #tpu.memory_space<vmem>>, %arg13: memref<1x32xf32, #tpu.memory_space<vmem>>, %arg14: memref<32x128xf32, #tpu.memory_space<vmem>>, %arg15: memref<1x128xf32, #tpu.memory_space<vmem>>, %arg16: memref<1x1x128xf32, #tpu.memory_space<vmem>>, %arg17: memref<24x32xf32, #tpu.memory_space<vmem>>) attributes {dimension_semantics = [#tpu.dimension_semantics<parallel>, #tpu.dimension_semantics<arbitrary>], iteration_bounds = array<i64: 2, 2>, scalar_prefetch = 0 : i64, scratch_operands = 1 : i64, tpu.core_type = #tpu.core_type<tc>, window_params = [{transform_indices = @transform_0, window_bounds = array<i64: 1, 24, 64>}, {pipeline_mode = #tpu.pipeline_mode<synchronous>, transform_indices = @transform_1, window_bounds = array<i64: 64, 32>}, {pipeline_mode = #tpu.pipeline_mode<synchronous>, transform_indices = @transform_2, window_bounds = array<i64: 24, 32>}, {transform_indices = @transform_3, window_bounds = array<i64: 1, 32, 96>}, {transform_indices = @transform_4, window_bounds = array<i64: 1, 1, 96>}, {transform_indices = @transform_5, window_bounds = array<i64: 1, 32, 32>}, {transform_indices = @transform_6, window_bounds = array<i64: 1, 6, 32>}, {transform_indices = @transform_7, window_bounds = array<i64: 1, 32, 64>}, {transform_indices = @transform_8, window_bounds = array<i64: 1, 1, 64>}, {transform_indices = @transform_9, window_bounds = array<i64: 1, 64, 32>}, {pipeline_mode = #tpu.pipeline_mode<synchronous>, transform_indices = @transform_10, window_bounds = array<i64: 1, 32>}, {pipeline_mode = #tpu.pipeline_mode<synchronous>, transform_indices = @transform_11, window_bounds = array<i64: 1, 32>}, {pipeline_mode = #tpu.pipeline_mode<synchronous>, transform_indices = @transform_12, window_bounds = array<i64: 32, 128>}, {pipeline_mode = #tpu.pipeline_mode<synchronous>, transform_indices = @transform_13, window_bounds = array<i64: 1, 128>}, {transform_indices = @transform_14, window_bounds = array<i64: 1, 1, 128>}]} {
    %c0_i32 = arith.constant 0 : i32
    %0 = arith.cmpi eq, %arg1, %c0_i32 : i32
    %1 = arith.extui %0 : i1 to i32
    %c0_i32_0 = arith.constant 0 : i32
    %2 = arith.cmpi ne, %1, %c0_i32_0 : i32
    scf.if %2 {
      %c0_78 = arith.constant 0 : index
      %c0_79 = arith.constant 0 : index
      %c0_80 = arith.constant 0 : index
      %214 = vector.load %arg2[%c0_78, %c0_79, %c0_80] : memref<1x24x64xf32, #tpu.memory_space<vmem>>, vector<1x24x64xf32>
      %215 = vector.shape_cast %214 : vector<1x24x64xf32> to vector<24x64xf32>
      %c0_81 = arith.constant 0 : index
      %c0_82 = arith.constant 0 : index
      %216 = vector.load %arg3[%c0_81, %c0_82] : memref<64x32xf32, #tpu.memory_space<vmem>>, vector<64x32xf32>
      %cst_83 = arith.constant dense<0.000000e+00> : vector<24x32xf32>
      %217 = tpu.matmul %215, %216, %cst_83 {dimension_numbers = #tpu.dot_dimension_numbers<[1], [0], [0], [1], [0, 0, 1, 1], [], []>} : vector<24x64xf32>, vector<64x32xf32>, vector<24x32xf32> -> vector<24x32xf32>
      %c0_84 = arith.constant 0 : index
      %c0_85 = arith.constant 0 : index
      %218 = vector.load %arg4[%c0_84, %c0_85] : memref<24x32xf32, #tpu.memory_space<vmem>>, vector<24x32xf32>
      %219 = arith.addf %217, %218 : vector<24x32xf32>
      %c0_86 = arith.constant 0 : index
      %c0_87 = arith.constant 0 : index
      %220 = vector.load %arg17[%c0_86, %c0_87] : memref<24x32xf32, #tpu.memory_space<vmem>>, vector<24x32xf32>
      tpu.vector_store %arg17[%c0_86, %c0_87], %219 {strides = array<i32>} : memref<24x32xf32, #tpu.memory_space<vmem>>, vector<24x32xf32>,
    } else {
    }
    %c0 = arith.constant 0 : index
    %c0_1 = arith.constant 0 : index
    %3 = vector.load %arg17[%c0, %c0_1] : memref<24x32xf32, #tpu.memory_space<vmem>>, vector<24x32xf32>
    %c0_2 = arith.constant 0 : index
    %c0_3 = arith.constant 0 : index
    %c0_4 = arith.constant 0 : index
    %4 = vector.load %arg8[%c0_2, %c0_3, %c0_4] : memref<1x6x32xf32, #tpu.memory_space<vmem>>, vector<1x6x32xf32>
    %5 = vector.shape_cast %4 : vector<1x6x32xf32> to vector<6x32xf32>
    %6 = vector.extract_strided_slice %5 {offsets = [0, 0], sizes = [1, 32], strides = [1, 1]} : vector<6x32xf32> to vector<1x32xf32>
    %7 = vector.extract_strided_slice %5 {offsets = [1, 0], sizes = [1, 32], strides = [1, 1]} : vector<6x32xf32> to vector<1x32xf32>
    %8 = vector.extract_strided_slice %5 {offsets = [2, 0], sizes = [1, 32], strides = [1, 1]} : vector<6x32xf32> to vector<1x32xf32>
    %9 = vector.extract_strided_slice %5 {offsets = [3, 0], sizes = [1, 32], strides = [1, 1]} : vector<6x32xf32> to vector<1x32xf32>
    %10 = vector.extract_strided_slice %5 {offsets = [4, 0], sizes = [1, 32], strides = [1, 1]} : vector<6x32xf32> to vector<1x32xf32>
    %11 = vector.extract_strided_slice %5 {offsets = [5, 0], sizes = [1, 32], strides = [1, 1]} : vector<6x32xf32> to vector<1x32xf32>
    %cst = arith.constant dense<0.000000e+00> : vector<24xf32>
    %12 = vector.multi_reduction <add>, %3, %cst [1] : vector<24x32xf32> to vector<24xf32>
    %13 = vector.shape_cast %12 : vector<24xf32> to vector<24x1xf32>
    %cst_5 = arith.constant 3.200000e+01 : f32
    %14 = vector.broadcast %cst_5 : f32 to vector<24x1xf32>
    %15 = arith.divf %13, %14 : vector<24x1xf32>
    %16 = vector.broadcast %15 : vector<24x1xf32> to vector<24x32xf32>
    %17 = arith.subf %3, %16 : vector<24x32xf32>
    %18 = arith.mulf %17, %17 : vector<24x32xf32>
    %cst_6 = arith.constant dense<0.000000e+00> : vector<24xf32>
    %19 = vector.multi_reduction <add>, %18, %cst_6 [1] : vector<24x32xf32> to vector<24xf32>
    %20 = vector.shape_cast %19 : vector<24xf32> to vector<24x1xf32>
    %cst_7 = arith.constant 3.200000e+01 : f32
    %21 = vector.broadcast %cst_7 : f32 to vector<24x1xf32>
    %22 = arith.divf %20, %21 : vector<24x1xf32>
    %cst_8 = arith.constant 9.99999974E-6 : f32
    %23 = vector.broadcast %cst_8 : f32 to vector<24x1xf32>
    %24 = arith.addf %22, %23 : vector<24x1xf32>
    %25 = math.rsqrt %24 : vector<24x1xf32>
    %26 = vector.broadcast %25 : vector<24x1xf32> to vector<24x32xf32>
    %27 = arith.mulf %17, %26 : vector<24x32xf32>
    %28 = vector.broadcast %6 : vector<1x32xf32> to vector<24x32xf32>
    %29 = arith.mulf %27, %28 : vector<24x32xf32>
    %30 = vector.broadcast %7 : vector<1x32xf32> to vector<24x32xf32>
    %31 = arith.addf %29, %30 : vector<24x32xf32>
    %c0_9 = arith.constant 0 : index
    %c0_10 = arith.constant 0 : index
    %c0_11 = arith.constant 0 : index
    %32 = vector.load %arg5[%c0_9, %c0_10, %c0_11] : memref<1x32x96xf32, #tpu.memory_space<vmem>>, vector<1x32x96xf32>
    %33 = vector.shape_cast %32 : vector<1x32x96xf32> to vector<32x96xf32>
    %cst_12 = arith.constant dense<0.000000e+00> : vector<24x96xf32>
    %34 = tpu.matmul %31, %33, %cst_12 {dimension_numbers = #tpu.dot_dimension_numbers<[1], [0], [0], [1], [0, 0, 1, 1], [], []>} : vector<24x32xf32>, vector<32x96xf32>, vector<24x96xf32> -> vector<24x96xf32>
    %c0_13 = arith.constant 0 : index
    %c0_14 = arith.constant 0 : index
    %c0_15 = arith.constant 0 : index
    %35 = vector.load %arg6[%c0_13, %c0_14, %c0_15] : memref<1x1x96xf32, #tpu.memory_space<vmem>>, vector<1x1x96xf32>
    %36 = vector.shape_cast %35 : vector<1x1x96xf32> to vector<1x96xf32>
    %37 = vector.broadcast %36 : vector<1x96xf32> to vector<24x96xf32>
    %38 = arith.addf %34, %37 : vector<24x96xf32>
    %39 = vector.extract_strided_slice %38 {offsets = [0, 0], sizes = [24, 32], strides = [1, 1]} : vector<24x96xf32> to vector<24x32xf32>
    %cst_16 = arith.constant 0.353553385 : f32
    %40 = vector.broadcast %cst_16 : f32 to vector<24x32xf32>
    %41 = arith.mulf %39, %40 : vector<24x32xf32>
    %42 = vector.extract_strided_slice %38 {offsets = [0, 32], sizes = [24, 32], strides = [1, 1]} : vector<24x96xf32> to vector<24x32xf32>
    %43 = vector.extract_strided_slice %38 {offsets = [0, 64], sizes = [24, 32], strides = [1, 1]} : vector<24x96xf32> to vector<24x32xf32>
    %44 = tpu.iota {dimensions = array<i32: 1>} : vector<1x24xi32>
    %c17_i32 = arith.constant 17 : i32
    %45 = vector.broadcast %c17_i32 : i32 to vector<1x24xi32>
    %46 = arith.cmpi slt, %44, %45 : vector<1x24xi32>
    %cst_17 = arith.constant 0.000000e+00 : f32
    %cst_18 = arith.constant -1.000000e+30 : f32
    %47 = vector.broadcast %cst_17 : f32 to vector<1x24xf32>
    %48 = vector.broadcast %cst_18 : f32 to vector<1x24xf32>
    %49 = arith.select %46, %47, %48 : vector<1x24xi1>, vector<1x24xf32>
    %c0_19 = arith.constant 0 : index
    %c0_20 = arith.constant 0 : index
    %c0_21 = arith.constant 0 : index
    %50 = vector.load %arg7[%c0_19, %c0_20, %c0_21] : memref<1x32x32xf32, #tpu.memory_space<vmem>>, vector<1x32x32xf32>
    %51 = vector.shape_cast %50 : vector<1x32x32xf32> to vector<32x32xf32>
    %cst_22 = arith.constant 0.000000e+00 : f32
    %52 = vector.broadcast %cst_22 : f32 to vector<24x32xf32>
    %53 = vector.extract_strided_slice %41 {offsets = [0, 0], sizes = [24, 8], strides = [1, 1]} : vector<24x32xf32> to vector<24x8xf32>
    %54 = vector.extract_strided_slice %42 {offsets = [0, 0], sizes = [24, 8], strides = [1, 1]} : vector<24x32xf32> to vector<24x8xf32>
    %55 = vector.extract_strided_slice %43 {offsets = [0, 0], sizes = [24, 8], strides = [1, 1]} : vector<24x32xf32> to vector<24x8xf32>
    "tpu.trace_start"() <{level = 10 : i32, message = "qd,kd->qk"}> : () -> ()
    %cst_23 = arith.constant dense<0.000000e+00> : vector<24x24xf32>
    %56 = tpu.matmul %53, %54, %cst_23 {dimension_numbers = #tpu.dot_dimension_numbers<[1], [1], [0], [0], [0, 0, 1, 0], [], []>} : vector<24x8xf32>, vector<24x8xf32>, vector<24x24xf32> -> vector<24x24xf32>
    "tpu.trace_stop"() : () -> ()
    %57 = vector.broadcast %49 : vector<1x24xf32> to vector<24x24xf32>
    %58 = arith.addf %56, %57 : vector<24x24xf32>
    %cst_24 = arith.constant dense<0xFF800000> : vector<24xf32>
    %59 = vector.multi_reduction <maximumf>, %58, %cst_24 [1] : vector<24x24xf32> to vector<24xf32>
    %60 = vector.shape_cast %59 : vector<24xf32> to vector<24x1xf32>
    %61 = vector.broadcast %60 : vector<24x1xf32> to vector<24x24xf32>
    %62 = arith.subf %58, %61 : vector<24x24xf32>
    %63 = math.exp %62 : vector<24x24xf32>
    %cst_25 = arith.constant dense<0.000000e+00> : vector<24xf32>
    %64 = vector.multi_reduction <add>, %63, %cst_25 [1] : vector<24x24xf32> to vector<24xf32>
    %65 = vector.shape_cast %64 : vector<24xf32> to vector<24x1xf32>
    %66 = tpu.reciprocal %65 {approx = true} : vector<24x1xf32> -> vector<24x1xf32>
    %67 = vector.broadcast %66 : vector<24x1xf32> to vector<24x24xf32>
    %68 = arith.mulf %63, %67 : vector<24x24xf32>
    %cst_26 = arith.constant dense<0.000000e+00> : vector<24x8xf32>
    %69 = tpu.matmul %68, %55, %cst_26 {dimension_numbers = #tpu.dot_dimension_numbers<[1], [0], [0], [1], [0, 0, 1, 1], [], []>} : vector<24x24xf32>, vector<24x8xf32>, vector<24x8xf32> -> vector<24x8xf32>
    %70 = vector.extract_strided_slice %51 {offsets = [0, 0], sizes = [8, 32], strides = [1, 1]} : vector<32x32xf32> to vector<8x32xf32>
    %cst_27 = arith.constant dense<0.000000e+00> : vector<24x32xf32>
    %71 = tpu.matmul %69, %70, %cst_27 {dimension_numbers = #tpu.dot_dimension_numbers<[1], [0], [0], [1], [0, 0, 1, 1], [], []>} : vector<24x8xf32>, vector<8x32xf32>, vector<24x32xf32> -> vector<24x32xf32>
    %72 = arith.addf %52, %71 : vector<24x32xf32>
    %73 = vector.extract_strided_slice %41 {offsets = [0, 8], sizes = [24, 8], strides = [1, 1]} : vector<24x32xf32> to vector<24x8xf32>
    %74 = vector.extract_strided_slice %42 {offsets = [0, 8], sizes = [24, 8], strides = [1, 1]} : vector<24x32xf32> to vector<24x8xf32>
    %75 = vector.extract_strided_slice %43 {offsets = [0, 8], sizes = [24, 8], strides = [1, 1]} : vector<24x32xf32> to vector<24x8xf32>
    "tpu.trace_start"() <{level = 10 : i32, message = "qd,kd->qk"}> : () -> ()
    %cst_28 = arith.constant dense<0.000000e+00> : vector<24x24xf32>
    %76 = tpu.matmul %73, %74, %cst_28 {dimension_numbers = #tpu.dot_dimension_numbers<[1], [1], [0], [0], [0, 0, 1, 0], [], []>} : vector<24x8xf32>, vector<24x8xf32>, vector<24x24xf32> -> vector<24x24xf32>
    "tpu.trace_stop"() : () -> ()
    %77 = vector.broadcast %49 : vector<1x24xf32> to vector<24x24xf32>
    %78 = arith.addf %76, %77 : vector<24x24xf32>
    %cst_29 = arith.constant dense<0xFF800000> : vector<24xf32>
    %79 = vector.multi_reduction <maximumf>, %78, %cst_29 [1] : vector<24x24xf32> to vector<24xf32>
    %80 = vector.shape_cast %79 : vector<24xf32> to vector<24x1xf32>
    %81 = vector.broadcast %80 : vector<24x1xf32> to vector<24x24xf32>
    %82 = arith.subf %78, %81 : vector<24x24xf32>
    %83 = math.exp %82 : vector<24x24xf32>
    %cst_30 = arith.constant dense<0.000000e+00> : vector<24xf32>
    %84 = vector.multi_reduction <add>, %83, %cst_30 [1] : vector<24x24xf32> to vector<24xf32>
    %85 = vector.shape_cast %84 : vector<24xf32> to vector<24x1xf32>
    %86 = tpu.reciprocal %85 {approx = true} : vector<24x1xf32> -> vector<24x1xf32>
    %87 = vector.broadcast %86 : vector<24x1xf32> to vector<24x24xf32>
    %88 = arith.mulf %83, %87 : vector<24x24xf32>
    %cst_31 = arith.constant dense<0.000000e+00> : vector<24x8xf32>
    %89 = tpu.matmul %88, %75, %cst_31 {dimension_numbers = #tpu.dot_dimension_numbers<[1], [0], [0], [1], [0, 0, 1, 1], [], []>} : vector<24x24xf32>, vector<24x8xf32>, vector<24x8xf32> -> vector<24x8xf32>
    %90 = vector.extract_strided_slice %51 {offsets = [8, 0], sizes = [8, 32], strides = [1, 1]} : vector<32x32xf32> to vector<8x32xf32>
    %cst_32 = arith.constant dense<0.000000e+00> : vector<24x32xf32>
    %91 = tpu.matmul %89, %90, %cst_32 {dimension_numbers = #tpu.dot_dimension_numbers<[1], [0], [0], [1], [0, 0, 1, 1], [], []>} : vector<24x8xf32>, vector<8x32xf32>, vector<24x32xf32> -> vector<24x32xf32>
    %92 = arith.addf %72, %91 : vector<24x32xf32>
    %93 = vector.extract_strided_slice %41 {offsets = [0, 16], sizes = [24, 8], strides = [1, 1]} : vector<24x32xf32> to vector<24x8xf32>
    %94 = vector.extract_strided_slice %42 {offsets = [0, 16], sizes = [24, 8], strides = [1, 1]} : vector<24x32xf32> to vector<24x8xf32>
    %95 = vector.extract_strided_slice %43 {offsets = [0, 16], sizes = [24, 8], strides = [1, 1]} : vector<24x32xf32> to vector<24x8xf32>
    "tpu.trace_start"() <{level = 10 : i32, message = "qd,kd->qk"}> : () -> ()
    %cst_33 = arith.constant dense<0.000000e+00> : vector<24x24xf32>
    %96 = tpu.matmul %93, %94, %cst_33 {dimension_numbers = #tpu.dot_dimension_numbers<[1], [1], [0], [0], [0, 0, 1, 0], [], []>} : vector<24x8xf32>, vector<24x8xf32>, vector<24x24xf32> -> vector<24x24xf32>
    "tpu.trace_stop"() : () -> ()
    %97 = vector.broadcast %49 : vector<1x24xf32> to vector<24x24xf32>
    %98 = arith.addf %96, %97 : vector<24x24xf32>
    %cst_34 = arith.constant dense<0xFF800000> : vector<24xf32>
    %99 = vector.multi_reduction <maximumf>, %98, %cst_34 [1] : vector<24x24xf32> to vector<24xf32>
    %100 = vector.shape_cast %99 : vector<24xf32> to vector<24x1xf32>
    %101 = vector.broadcast %100 : vector<24x1xf32> to vector<24x24xf32>
    %102 = arith.subf %98, %101 : vector<24x24xf32>
    %103 = math.exp %102 : vector<24x24xf32>
    %cst_35 = arith.constant dense<0.000000e+00> : vector<24xf32>
    %104 = vector.multi_reduction <add>, %103, %cst_35 [1] : vector<24x24xf32> to vector<24xf32>
    %105 = vector.shape_cast %104 : vector<24xf32> to vector<24x1xf32>
    %106 = tpu.reciprocal %105 {approx = true} : vector<24x1xf32> -> vector<24x1xf32>
    %107 = vector.broadcast %106 : vector<24x1xf32> to vector<24x24xf32>
    %108 = arith.mulf %103, %107 : vector<24x24xf32>
    %cst_36 = arith.constant dense<0.000000e+00> : vector<24x8xf32>
    %109 = tpu.matmul %108, %95, %cst_36 {dimension_numbers = #tpu.dot_dimension_numbers<[1], [0], [0], [1], [0, 0, 1, 1], [], []>} : vector<24x24xf32>, vector<24x8xf32>, vector<24x8xf32> -> vector<24x8xf32>
    %110 = vector.extract_strided_slice %51 {offsets = [16, 0], sizes = [8, 32], strides = [1, 1]} : vector<32x32xf32> to vector<8x32xf32>
    %cst_37 = arith.constant dense<0.000000e+00> : vector<24x32xf32>
    %111 = tpu.matmul %109, %110, %cst_37 {dimension_numbers = #tpu.dot_dimension_numbers<[1], [0], [0], [1], [0, 0, 1, 1], [], []>} : vector<24x8xf32>, vector<8x32xf32>, vector<24x32xf32> -> vector<24x32xf32>
    %112 = arith.addf %92, %111 : vector<24x32xf32>
    %113 = vector.extract_strided_slice %41 {offsets = [0, 24], sizes = [24, 8], strides = [1, 1]} : vector<24x32xf32> to vector<24x8xf32>
    %114 = vector.extract_strided_slice %42 {offsets = [0, 24], sizes = [24, 8], strides = [1, 1]} : vector<24x32xf32> to vector<24x8xf32>
    %115 = vector.extract_strided_slice %43 {offsets = [0, 24], sizes = [24, 8], strides = [1, 1]} : vector<24x32xf32> to vector<24x8xf32>
    "tpu.trace_start"() <{level = 10 : i32, message = "qd,kd->qk"}> : () -> ()
    %cst_38 = arith.constant dense<0.000000e+00> : vector<24x24xf32>
    %116 = tpu.matmul %113, %114, %cst_38 {dimension_numbers = #tpu.dot_dimension_numbers<[1], [1], [0], [0], [0, 0, 1, 0], [], []>} : vector<24x8xf32>, vector<24x8xf32>, vector<24x24xf32> -> vector<24x24xf32>
    "tpu.trace_stop"() : () -> ()
    %117 = vector.broadcast %49 : vector<1x24xf32> to vector<24x24xf32>
    %118 = arith.addf %116, %117 : vector<24x24xf32>
    %cst_39 = arith.constant dense<0xFF800000> : vector<24xf32>
    %119 = vector.multi_reduction <maximumf>, %118, %cst_39 [1] : vector<24x24xf32> to vector<24xf32>
    %120 = vector.shape_cast %119 : vector<24xf32> to vector<24x1xf32>
    %121 = vector.broadcast %120 : vector<24x1xf32> to vector<24x24xf32>
    %122 = arith.subf %118, %121 : vector<24x24xf32>
    %123 = math.exp %122 : vector<24x24xf32>
    %cst_40 = arith.constant dense<0.000000e+00> : vector<24xf32>
    %124 = vector.multi_reduction <add>, %123, %cst_40 [1] : vector<24x24xf32> to vector<24xf32>
    %125 = vector.shape_cast %124 : vector<24xf32> to vector<24x1xf32>
    %126 = tpu.reciprocal %125 {approx = true} : vector<24x1xf32> -> vector<24x1xf32>
    %127 = vector.broadcast %126 : vector<24x1xf32> to vector<24x24xf32>
    %128 = arith.mulf %123, %127 : vector<24x24xf32>
    %cst_41 = arith.constant dense<0.000000e+00> : vector<24x8xf32>
    %129 = tpu.matmul %128, %115, %cst_41 {dimension_numbers = #tpu.dot_dimension_numbers<[1], [0], [0], [1], [0, 0, 1, 1], [], []>} : vector<24x24xf32>, vector<24x8xf32>, vector<24x8xf32> -> vector<24x8xf32>
    %130 = vector.extract_strided_slice %51 {offsets = [24, 0], sizes = [8, 32], strides = [1, 1]} : vector<32x32xf32> to vector<8x32xf32>
    %cst_42 = arith.constant dense<0.000000e+00> : vector<24x32xf32>
    %131 = tpu.matmul %129, %130, %cst_42 {dimension_numbers = #tpu.dot_dimension_numbers<[1], [0], [0], [1], [0, 0, 1, 1], [], []>} : vector<24x8xf32>, vector<8x32xf32>, vector<24x32xf32> -> vector<24x32xf32>
    %132 = arith.addf %112, %131 : vector<24x32xf32>
    %133 = arith.addf %3, %132 : vector<24x32xf32>
    %134 = vector.broadcast %10 : vector<1x32xf32> to vector<24x32xf32>
    %135 = arith.addf %133, %134 : vector<24x32xf32>
    %cst_43 = arith.constant dense<0.000000e+00> : vector<24xf32>
    %136 = vector.multi_reduction <add>, %135, %cst_43 [1] : vector<24x32xf32> to vector<24xf32>
    %137 = vector.shape_cast %136 : vector<24xf32> to vector<24x1xf32>
    %cst_44 = arith.constant 3.200000e+01 : f32
    %138 = vector.broadcast %cst_44 : f32 to vector<24x1xf32>
    %139 = arith.divf %137, %138 : vector<24x1xf32>
    %140 = vector.broadcast %139 : vector<24x1xf32> to vector<24x32xf32>
    %141 = arith.subf %135, %140 : vector<24x32xf32>
    %142 = arith.mulf %141, %141 : vector<24x32xf32>
    %cst_45 = arith.constant dense<0.000000e+00> : vector<24xf32>
    %143 = vector.multi_reduction <add>, %142, %cst_45 [1] : vector<24x32xf32> to vector<24xf32>
    %144 = vector.shape_cast %143 : vector<24xf32> to vector<24x1xf32>
    %cst_46 = arith.constant 3.200000e+01 : f32
    %145 = vector.broadcast %cst_46 : f32 to vector<24x1xf32>
    %146 = arith.divf %144, %145 : vector<24x1xf32>
    %cst_47 = arith.constant 9.99999974E-6 : f32
    %147 = vector.broadcast %cst_47 : f32 to vector<24x1xf32>
    %148 = arith.addf %146, %147 : vector<24x1xf32>
    %149 = math.rsqrt %148 : vector<24x1xf32>
    %150 = vector.broadcast %149 : vector<24x1xf32> to vector<24x32xf32>
    %151 = arith.mulf %141, %150 : vector<24x32xf32>
    %152 = vector.broadcast %8 : vector<1x32xf32> to vector<24x32xf32>
    %153 = arith.mulf %151, %152 : vector<24x32xf32>
    %154 = vector.broadcast %9 : vector<1x32xf32> to vector<24x32xf32>
    %155 = arith.addf %153, %154 : vector<24x32xf32>
    %c0_48 = arith.constant 0 : index
    %c0_49 = arith.constant 0 : index
    %c0_50 = arith.constant 0 : index
    %156 = vector.load %arg9[%c0_48, %c0_49, %c0_50] : memref<1x32x64xf32, #tpu.memory_space<vmem>>, vector<1x32x64xf32>
    %157 = vector.shape_cast %156 : vector<1x32x64xf32> to vector<32x64xf32>
    %cst_51 = arith.constant dense<0.000000e+00> : vector<24x64xf32>
    %158 = tpu.matmul %155, %157, %cst_51 {dimension_numbers = #tpu.dot_dimension_numbers<[1], [0], [0], [1], [0, 0, 1, 1], [], []>} : vector<24x32xf32>, vector<32x64xf32>, vector<24x64xf32> -> vector<24x64xf32>
    %c0_52 = arith.constant 0 : index
    %c0_53 = arith.constant 0 : index
    %c0_54 = arith.constant 0 : index
    %159 = vector.load %arg10[%c0_52, %c0_53, %c0_54] : memref<1x1x64xf32, #tpu.memory_space<vmem>>, vector<1x1x64xf32>
    %160 = vector.shape_cast %159 : vector<1x1x64xf32> to vector<1x64xf32>
    %161 = vector.broadcast %160 : vector<1x64xf32> to vector<24x64xf32>
    %162 = arith.addf %158, %161 : vector<24x64xf32>
    %cst_55 = arith.constant 5.000000e-01 : f32
    %163 = vector.broadcast %cst_55 : f32 to vector<24x64xf32>
    %164 = arith.mulf %163, %162 : vector<24x64xf32>
    %cst_56 = arith.constant 0.707106769 : f32
    %165 = vector.broadcast %cst_56 : f32 to vector<24x64xf32>
    %166 = arith.mulf %162, %165 : vector<24x64xf32>
    %cst_57 = arith.constant 0.000000e+00 : f32
    %167 = vector.broadcast %cst_57 : f32 to vector<24x64xf32>
    %168 = arith.cmpf oge, %166, %167 : vector<24x64xf32>
    %cst_58 = arith.constant 1.000000e+00 : f32
    %cst_59 = arith.constant -1.000000e+00 : f32
    %169 = vector.broadcast %cst_58 : f32 to vector<24x64xf32>
    %170 = vector.broadcast %cst_59 : f32 to vector<24x64xf32>
    %171 = arith.select %168, %169, %170 : vector<24x64xi1>, vector<24x64xf32>
    %172 = math.absf %166 : vector<24x64xf32>
    %cst_60 = arith.constant 0.327591091 : f32
    %173 = vector.broadcast %cst_60 : f32 to vector<24x64xf32>
    %174 = arith.mulf %173, %172 : vector<24x64xf32>
    %cst_61 = arith.constant 1.000000e+00 : f32
    %175 = vector.broadcast %cst_61 : f32 to vector<24x64xf32>
    %176 = arith.addf %175, %174 : vector<24x64xf32>
    %cst_62 = arith.constant 1.000000e+00 : f32
    %177 = vector.broadcast %cst_62 : f32 to vector<24x64xf32>
    %178 = arith.divf %177, %176 : vector<24x64xf32>
    %cst_63 = arith.constant 1.06140542 : f32
    %179 = vector.broadcast %cst_63 : f32 to vector<24x64xf32>
    %180 = arith.mulf %179, %178 : vector<24x64xf32>
    %cst_64 = arith.constant -1.45315206 : f32
    %181 = vector.broadcast %cst_64 : f32 to vector<24x64xf32>
    %182 = arith.addf %180, %181 : vector<24x64xf32>
    %183 = arith.mulf %182, %178 : vector<24x64xf32>
    %cst_65 = arith.constant 1.42141378 : f32
    %184 = vector.broadcast %cst_65 : f32 to vector<24x64xf32>
    %185 = arith.addf %183, %184 : vector<24x64xf32>
    %186 = arith.mulf %185, %178 : vector<24x64xf32>
    %cst_66 = arith.constant -0.284496725 : f32
    %187 = vector.broadcast %cst_66 : f32 to vector<24x64xf32>
    %188 = arith.addf %186, %187 : vector<24x64xf32>
    %189 = arith.mulf %188, %178 : vector<24x64xf32>
    %cst_67 = arith.constant 0.254829586 : f32
    %190 = vector.broadcast %cst_67 : f32 to vector<24x64xf32>
    %191 = arith.addf %189, %190 : vector<24x64xf32>
    %192 = arith.mulf %191, %178 : vector<24x64xf32>
    %cst_68 = arith.constant 0.000000e+00 : f32
    %193 = vector.broadcast %cst_68 : f32 to vector<24x64xf32>
    %194 = arith.subf %193, %172 : vector<24x64xf32>
    %195 = arith.mulf %194, %172 : vector<24x64xf32>
    %196 = math.exp %195 : vector<24x64xf32>
    %197 = arith.mulf %192, %196 : vector<24x64xf32>
    %cst_69 = arith.constant 1.000000e+00 : f32
    %198 = vector.broadcast %cst_69 : f32 to vector<24x64xf32>
    %199 = arith.subf %198, %197 : vector<24x64xf32>
    %200 = arith.mulf %171, %199 : vector<24x64xf32>
    %cst_70 = arith.constant 1.000000e+00 : f32
    %201 = vector.broadcast %cst_70 : f32 to vector<24x64xf32>
    %202 = arith.addf %201, %200 : vector<24x64xf32>
    %203 = arith.mulf %164, %202 : vector<24x64xf32>
    %c0_71 = arith.constant 0 : index
    %c0_72 = arith.constant 0 : index
    %c0_73 = arith.constant 0 : index
    %204 = vector.load %arg11[%c0_71, %c0_72, %c0_73] : memref<1x64x32xf32, #tpu.memory_space<vmem>>, vector<1x64x32xf32>
    %205 = vector.shape_cast %204 : vector<1x64x32xf32> to vector<64x32xf32>
    %cst_74 = arith.constant dense<0.000000e+00> : vector<24x32xf32>
    %206 = tpu.matmul %203, %205, %cst_74 {dimension_numbers = #tpu.dot_dimension_numbers<[1], [0], [0], [1], [0, 0, 1, 1], [], []>} : vector<24x64xf32>, vector<64x32xf32>, vector<24x32xf32> -> vector<24x32xf32>
    %207 = vector.broadcast %11 : vector<1x32xf32> to vector<24x32xf32>
    %208 = arith.addf %206, %207 : vector<24x32xf32>
    %209 = arith.addf %135, %208 : vector<24x32xf32>
    %c0_75 = arith.constant 0 : index
    %c0_76 = arith.constant 0 : index
    %210 = vector.load %arg17[%c0_75, %c0_76] : memref<24x32xf32, #tpu.memory_space<vmem>>, vector<24x32xf32>
    tpu.vector_store %arg17[%c0_75, %c0_76], %209 {strides = array<i32>} : memref<24x32xf32, #tpu.memory_space<vmem>>, vector<24x32xf32>,
    %c1_i32 = arith.constant 1 : i32
    %211 = arith.cmpi eq, %arg1, %c1_i32 : i32
    %212 = arith.extui %211 : i1 to i32
    %c0_i32_77 = arith.constant 0 : i32
    %213 = arith.cmpi ne, %212, %c0_i32_77 : i32
    scf.if %213 {
      %214 = vector.extract_strided_slice %209 {offsets = [0, 0], sizes = [1, 32], strides = [1, 1]} : vector<24x32xf32> to vector<1x32xf32>
      %c0_78 = arith.constant 0 : index
      %c0_79 = arith.constant 0 : index
      %215 = vector.load %arg12[%c0_78, %c0_79] : memref<1x32xf32, #tpu.memory_space<vmem>>, vector<1x32xf32>
      %c0_80 = arith.constant 0 : index
      %c0_81 = arith.constant 0 : index
      %216 = vector.load %arg13[%c0_80, %c0_81] : memref<1x32xf32, #tpu.memory_space<vmem>>, vector<1x32xf32>
      %cst_82 = arith.constant dense<0.000000e+00> : vector<1xf32>
      %217 = vector.multi_reduction <add>, %214, %cst_82 [1] : vector<1x32xf32> to vector<1xf32>
      %218 = vector.shape_cast %217 : vector<1xf32> to vector<1x1xf32>
      %cst_83 = arith.constant 3.200000e+01 : f32
      %219 = vector.broadcast %cst_83 : f32 to vector<1x1xf32>
      %220 = arith.divf %218, %219 : vector<1x1xf32>
      %221 = vector.broadcast %220 : vector<1x1xf32> to vector<1x32xf32>
      %222 = arith.subf %214, %221 : vector<1x32xf32>
      %223 = arith.mulf %222, %222 : vector<1x32xf32>
      %cst_84 = arith.constant dense<0.000000e+00> : vector<1xf32>
      %224 = vector.multi_reduction <add>, %223, %cst_84 [1] : vector<1x32xf32> to vector<1xf32>
      %225 = vector.shape_cast %224 : vector<1xf32> to vector<1x1xf32>
      %cst_85 = arith.constant 3.200000e+01 : f32
      %226 = vector.broadcast %cst_85 : f32 to vector<1x1xf32>
      %227 = arith.divf %225, %226 : vector<1x1xf32>
      %cst_86 = arith.constant 9.99999974E-6 : f32
      %228 = vector.broadcast %cst_86 : f32 to vector<1x1xf32>
      %229 = arith.addf %227, %228 : vector<1x1xf32>
      %230 = math.rsqrt %229 : vector<1x1xf32>
      %231 = vector.broadcast %230 : vector<1x1xf32> to vector<1x32xf32>
      %232 = arith.mulf %222, %231 : vector<1x32xf32>
      %233 = arith.mulf %232, %215 : vector<1x32xf32>
      %234 = arith.addf %233, %216 : vector<1x32xf32>
      %c0_87 = arith.constant 0 : index
      %c0_88 = arith.constant 0 : index
      %235 = vector.load %arg14[%c0_87, %c0_88] : memref<32x128xf32, #tpu.memory_space<vmem>>, vector<32x128xf32>
      %cst_89 = arith.constant dense<0.000000e+00> : vector<1x128xf32>
      %236 = tpu.matmul %234, %235, %cst_89 {dimension_numbers = #tpu.dot_dimension_numbers<[1], [0], [0], [1], [0, 0, 1, 1], [], []>} : vector<1x32xf32>, vector<32x128xf32>, vector<1x128xf32> -> vector<1x128xf32>
      %c0_90 = arith.constant 0 : index
      %c0_91 = arith.constant 0 : index
      %237 = vector.load %arg15[%c0_90, %c0_91] : memref<1x128xf32, #tpu.memory_space<vmem>>, vector<1x128xf32>
      %238 = arith.addf %236, %237 : vector<1x128xf32>
      %c0_92 = arith.constant 0 : index
      %c0_93 = arith.constant 0 : index
      %c0_94 = arith.constant 0 : index
      %239 = vector.load %arg16[%c0_92, %c0_93, %c0_94] : memref<1x1x128xf32, #tpu.memory_space<vmem>>, vector<1x1x128xf32>
      %240 = vector.shape_cast %239 : vector<1x1x128xf32> to vector<1x128xf32>
      %241 = vector.shape_cast %238 : vector<1x128xf32> to vector<1x1x128xf32>
      tpu.vector_store %arg16[%c0_92, %c0_93, %c0_94], %241 {strides = array<i32>} : memref<1x1x128xf32, #tpu.memory_space<vmem>>, vector<1x1x128xf32>,
    } else {
    }
    return
  }
  func.func @transform_0(%arg0: i32, %arg1: i32) -> (i32, i32, i32) {
    %c0_i32 = arith.constant 0 : i32
    %c0_i32_0 = arith.constant 0 : i32
    %c0_i32_1 = arith.constant 0 : i32
    return %arg0, %c0_i32, %c0_i32_0 : i32, i32, i32
  }
  func.func @transform_1(%arg0: i32, %arg1: i32) -> (i32, i32) {
    %c0_i32 = arith.constant 0 : i32
    %c0_i32_0 = arith.constant 0 : i32
    %c0_i32_1 = arith.constant 0 : i32
    return %c0_i32, %c0_i32_0 : i32, i32
  }
  func.func @transform_2(%arg0: i32, %arg1: i32) -> (i32, i32) {
    %c0_i32 = arith.constant 0 : i32
    %c0_i32_0 = arith.constant 0 : i32
    %c0_i32_1 = arith.constant 0 : i32
    return %c0_i32, %c0_i32_0 : i32, i32
  }
  func.func @transform_3(%arg0: i32, %arg1: i32) -> (i32, i32, i32) {
    %c0_i32 = arith.constant 0 : i32
    %c0_i32_0 = arith.constant 0 : i32
    %c0_i32_1 = arith.constant 0 : i32
    return %arg1, %c0_i32, %c0_i32_0 : i32, i32, i32
  }
  func.func @transform_4(%arg0: i32, %arg1: i32) -> (i32, i32, i32) {
    %c0_i32 = arith.constant 0 : i32
    %c0_i32_0 = arith.constant 0 : i32
    %c0_i32_1 = arith.constant 0 : i32
    return %arg1, %c0_i32, %c0_i32_0 : i32, i32, i32
  }
  func.func @transform_5(%arg0: i32, %arg1: i32) -> (i32, i32, i32) {
    %c0_i32 = arith.constant 0 : i32
    %c0_i32_0 = arith.constant 0 : i32
    %c0_i32_1 = arith.constant 0 : i32
    return %arg1, %c0_i32, %c0_i32_0 : i32, i32, i32
  }
  func.func @transform_6(%arg0: i32, %arg1: i32) -> (i32, i32, i32) {
    %c0_i32 = arith.constant 0 : i32
    %c0_i32_0 = arith.constant 0 : i32
    %c0_i32_1 = arith.constant 0 : i32
    return %arg1, %c0_i32, %c0_i32_0 : i32, i32, i32
  }
  func.func @transform_7(%arg0: i32, %arg1: i32) -> (i32, i32, i32) {
    %c0_i32 = arith.constant 0 : i32
    %c0_i32_0 = arith.constant 0 : i32
    %c0_i32_1 = arith.constant 0 : i32
    return %arg1, %c0_i32, %c0_i32_0 : i32, i32, i32
  }
  func.func @transform_8(%arg0: i32, %arg1: i32) -> (i32, i32, i32) {
    %c0_i32 = arith.constant 0 : i32
    %c0_i32_0 = arith.constant 0 : i32
    %c0_i32_1 = arith.constant 0 : i32
    return %arg1, %c0_i32, %c0_i32_0 : i32, i32, i32
  }
  func.func @transform_9(%arg0: i32, %arg1: i32) -> (i32, i32, i32) {
    %c0_i32 = arith.constant 0 : i32
    %c0_i32_0 = arith.constant 0 : i32
    %c0_i32_1 = arith.constant 0 : i32
    return %arg1, %c0_i32, %c0_i32_0 : i32, i32, i32
  }
  func.func @transform_10(%arg0: i32, %arg1: i32) -> (i32, i32) {
    %c0_i32 = arith.constant 0 : i32
    %c0_i32_0 = arith.constant 0 : i32
    %c0_i32_1 = arith.constant 0 : i32
    return %c0_i32, %c0_i32_0 : i32, i32
  }
  func.func @transform_11(%arg0: i32, %arg1: i32) -> (i32, i32) {
    %c0_i32 = arith.constant 0 : i32
    %c0_i32_0 = arith.constant 0 : i32
    %c0_i32_1 = arith.constant 0 : i32
    return %c0_i32, %c0_i32_0 : i32, i32
  }
  func.func @transform_12(%arg0: i32, %arg1: i32) -> (i32, i32) {
    %c0_i32 = arith.constant 0 : i32
    %c0_i32_0 = arith.constant 0 : i32
    %c0_i32_1 = arith.constant 0 : i32
    return %c0_i32, %c0_i32_0 : i32, i32
  }
  func.func @transform_13(%arg0: i32, %arg1: i32) -> (i32, i32) {
    %c0_i32 = arith.constant 0 : i32
    %c0_i32_0 = arith.constant 0 : i32
    %c0_i32_1 = arith.constant 0 : i32
    return %c0_i32, %c0_i32_0 : i32, i32
  }
  func.func @transform_14(%arg0: i32, %arg1: i32) -> (i32, i32, i32) {
    %c0_i32 = arith.constant 0 : i32
    %c0_i32_0 = arith.constant 0 : i32
    %c0_i32_1 = arith.constant 0 : i32
    return %arg0, %c0_i32, %c0_i32_0 : i32, i32, i32
  }
}

</mosaic_0001>

<bundles_post_ra>
// kernel: vit_forward.1
= control target key start
LH: loop header
LB: loop body
LE: loop exit
PB: predicated region body
PF: predicated region fallthrough
CT: control target
= control target key end

     0   :  { %s4271_s0 = inlined_call_operand.vmem [shape: f32[2,24,64], index: 0, kind: input, shape index: {}]   ;;  %s4272_s1 = inlined_call_operand.vmem [shape: f32[64,32], index: 1, kind: input, shape index: {}]   ;;  %s4273_s2 = inlined_call_operand.vmem [shape: f32[24,32], index: 2, kind: input, shape index: {}]   ;;  %s4274_s3 = inlined_call_operand.vmem [shape: f32[2,32,96], index: 3, kind: input, shape index: {}]   ;;  %s4275_s4 = inlined_call_operand.vmem [shape: f32[2,1,96], index: 4, kind: input, shape index: {}]   ;;  %s4276_s5 = inlined_call_operand.vmem [shape: f32[2,32,32], index: 5, kind: input, shape index: {}]   ;;  %s4277_s6 = inlined_call_operand.vmem [shape: f32[2,6,32], index: 6, kind: input, shape index: {}]   ;;  %s4278_s7 = inlined_call_operand.vmem [shape: f32[2,32,64], index: 7, kind: input, shape index: {}]   ;;  %s4279_s8 = inlined_call_operand.vmem [shape: f32[2,1,64], index: 8, kind: input, shape index: {}]   ;;  %s4280_s9 = inlined_call_operand.vmem [shape: f32[2,64,32], index: 9, kind: input, shape index: {}]   ;;  %s4281_s10 = inlined_call_operand.vmem [shape: f32[1,32], index: 10, kind: input, shape index: {}]   ;;  %s4282_s11 = inlined_call_operand.vmem [shape: f32[1,32], index: 11, kind: input, shape index: {}]   ;;  %s4283_s12 = inlined_call_operand.vmem [shape: f32[32,128], index: 12, kind: input, shape index: {}]   ;;  %s4284_s13 = inlined_call_operand.vmem [shape: f32[1,128], index: 13, kind: input, shape index: {}]   ;;  %s4285_s14 = inlined_call_operand.hbm [shape: f32[2,1,128], index: 14, kind: output, shape index: {}]  }
   0x1   :  { %4298 = sst [smem:[#allocation17_spill]] %s4271_s0 }
   0x2   :  { %4299 = sst [smem:[#allocation18_spill]] %s4274_s3 }
   0x3   :  { %4300 = sst [smem:[#allocation19_spill]] %s4276_s5 }
   0x4   :  { %4301 = sst [smem:[#allocation20_spill]] %s4281_s10 }
   0x5   :  { %4302 = sst [smem:[#allocation21_spill]] %s4282_s11 }
   0x6   :  { %4303 = sst [smem:[#allocation22_spill]] %s4284_s13 }
   0x7   :  { %4304 = sst [smem:[#allocation23_spill]] %s4285_s14 }
   0x8   :  { %19 = vsyncpa [#allocation4], 0 }
   0x9   :  { %21 = vsyncpa [#allocation4 + $0x1], 0  ;;  %s3629_s29 = smov 0   ;;  %s3631_s30 = smov 0  }
   0xa   :  { %s3633_s15 = smov 0   ;;  %s3635_s16 = smov 0  }
   0xb   :  { %s3637_s17 = smov 0   ;;  %s3639_s18 = smov 0  }
   0xc   :  { %s3641_s19 = smov 0   ;;  %s3643_s20 = smov 0  }
   0xd LB: > { %4305 = sst [smem:[#allocation6_spill]] %s3504_s29  ;;  %s2798_s21 = sadd.s32 4294967295, %s3532_s20   ;;  %s3532_s20 = sphi %s3643_s20, %s27_s20   ;;  %s3528_s19 = sphi %s3641_s19, %s4338_s19   ;;  %s3524_s18 = sphi %s3639_s18, %s4341_s18   ;;  %s3520_s17 = sphi %s3637_s17, %s4336_s17   ;;  %s3516_s16 = sphi %s3635_s16, %s4335_s16   ;;  %s3512_s15 = sphi %s3633_s15, %s4334_s15   ;;  %s3508_s30 = sphi %s3631_s30, %s4340_s30   ;;  %s3504_s29 = sphi %s3629_s29, %s4339_s29  }
   0xe   : > { %4306 = sst [smem:[#allocation7_spill]] %s3512_s15  ;;  %s2799_s22 = sadd.s32 4294967294, %s3532_s20  }
   0xf   : > { %4307 = sst [smem:[#allocation8_spill]] %s3520_s17  ;;  %s36_s23 = sadd.s32 1, %s3524_s18 }
  0x10   : > { %4308 = sst [smem:[#allocation9_spill]] %s3524_s18  ;;  %p37_p0 = scmp.ge.s32.totalorder %s36_s23, 2 }
  0x11   : > { %4309 = sst [smem:[#allocation10_spill]] %s3528_s19  ;;  %s39_s24 = sadd.s32 1, %s3528_s19 }
  0x12   : > { %4310 = sst [smem:[#allocation11_spill]] %s3532_s20  ;;  %p390_p1 = scmp.ne.s32.totalorder %s3512_s15, %s3508_s30 }
  0x13   : > { %p391_p2 = scmp.eq.s32.totalorder %s2798_s21, 3  ;;  %s4343_s23 = smov (%p37_p0, %s36_s23), 0 }
  0x14   : > { %4311 = sst [smem:[#allocation12_spill]] %s4343_s23  ;;  %s4345_s24 = smov (!%p37_p0, %s39_s24), %s3528_s19 }
  0x15   : > { %p3678_p3 = por %p391_p2, %p390_p1  ;;  %p396_p4 = scmp.ne.s32.totalorder %s3508_s30, %s3504_s29 }
  0x16   : > { %p41_p5 = scmp.ge.s32.totalorder %s4345_s24, 2  ;;  %p397_p6 = scmp.eq.s32.totalorder %s2799_s22, 3 }
  0x17   : > { %s4312_s25 = scalar_select %p3678_p3, 1, 0 }
  0x18   : > { %p2802_p7 = scmp.ge.s32.totalorder %s3532_s20, 1  ;;  %p492_p8 = scmp.lt.s32.totalorder %s3532_s20, 5 }
  0x19   : > { %4313 = sst [smem:[#allocation13_spill]] %s4312_s25  ;;  %s4347_s24 = smov (%p41_p5, %s4345_s24), 0 }
  0x1a   : > { %4314 = sst [smem:[#allocation14_spill]] %s4347_s24  ;;  %p3688_p9 = por %p397_p6, %p396_p4 }
  0x1b   : > { %p493_p10 = pnand %p2802_p7, %p492_p8  ;;  %s377_s27 = ssub.s32 %s3528_s19, %s4347_s24 }
  0x1c   : > { %s4315_s26 = scalar_select %p3688_p9, 1, 0 }
  0x1d   : > { %s380_s28 = sadd.s32 1, %s3512_s15  ;;  %p378_p11 = scmp.eq.s32.totalorder %s377_s27, 0 }
  0x1e   : > { %4316 = sst [smem:[#allocation15_spill]] %s4315_s26  ;;  %496 = sbr.rel (%p493_p10) target bundleno = 4384 (0x1120), region = 76 }
  0x1f   : > { %s3696_s21 = scalar_select %p378_p11, %s3512_s15, %s380_s28  }
  0x20   : > { %p567_p12 = scmp.lt.s32.totalorder (!%p493_p10), %s3520_s17, 1  ;;  %p572_p13 = scmp.lt.s32.totalorder (!%p493_p10), %s3516_s16, 1 }
  0x21   : > { %4317 = sst [smem:[#allocation16_spill]] %s3696_s21  ;;  %p2813_p0 = scmp.ne.s32.totalorder (!%p493_p10), %s3516_s16, 0 }
  0x22   : > { %s4318_s0 = sld [smem:[#allocation17_spill]] (!%p493_p10) }
  0x23   : > { %s568_s23 = scalar_select %p567_p12, %s3520_s17, 1 }
  0x24   : > { %s3703_s18 = scalar_select %p572_p13, %s3516_s16, 1 }
  0x25   : > { %s3271_s27 = smul.u32 24, %s568_s23  ;;  %s4319_s3 = sld [smem:[#allocation18_spill]] }
  0x26   : > { %s2881_s28 = sshll.u32 %s3703_s18, 5  ;;  %s4320_s5 = sld [smem:[#allocation19_spill]] }
  0x27   : > { %s2808_s23 = sshll.u32 %s3703_s18, 3  ;;  %s3734_s26 = scalar_lea.vmem %s4278_s7, %s2881_s28 }
  0x28   : > { %s3713_s22 = scalar_lea.vmem %s4318_s0, %s3271_s27  ;;  %s3729_s19 = scalar_lea.vmem %s4277_s6, %s2808_s23 }
  0x29   : > { %s596_s20 = scalar_lea.vmem %s4279_s8, %s3703_s18  ;;  %s2884_s21 = sshll.u32 %s3703_s18, 6 }
  0x2a   : > { %s3744_s25 = scalar_lea.vmem %s4280_s9, %s2884_s21  ;;  %605 = sbr.rel (%p2813_p0) target bundleno = 264 (0x108), region = 80 }
  0x2b   : > { %s3718_s14 = scalar_lea.vmem %s4319_s3, %s2881_s28  ;;  %s4321_s3 = sand.u32 1, %s3508_s30  }
  0x2c   : > { %s3723_s13 = scalar_lea.vmem %s4320_s5, %s2881_s28  ;;  %s3748_s5 = scalar_lea.vmem [#allocation3], %s4321_s3 }
  0x2f   : > { %v616_v0 = vld [vmem:[%s4272_s1 + $0x38] sm:$0xff]  ;;  %v3534_v1 = vmov 0.0   ;;  %v615_v2 = vld [vmem:[%s4272_s1 + $0x30] sm:$0xff]  ;;  %v614_v3 = vld [vmem:[%s4272_s1 + $0x28] sm:$0xff]  ;;  %vm620_vm0 = vcmask 523264   ;;  %vm3535_vm1 = vmmov 0  }
  0x30   : > { %3249 = vmatprep.subr.mxu1 %v3534_v1  ;;  %2990 = vmatprep.subr.mxu0 %v3534_v1  ;;  %v613_v4 = vld [vmem:[%s4272_s1 + $0x20] sm:$0xff]  ;;  %v612_v5 = vld [vmem:[%s4272_s1 + $0x18] sm:$0xff]  ;;  %v611_v6 = vld [vmem:[%s4272_s1 + $0x10] sm:$0xff]  ;;  %vm710_vm2 = vcmask 261120  }
  0x31   : > { %3257 = vmatpush3.msra.mxu1 %v616_v0  ;;  %2991 = vmatpush3.msra.mxu0 %v616_v0  ;;  %v610_v7 = vld [vmem:[%s4272_s1 + $0x8] sm:$0xff]  ;;  %v609_v8 = vld [vmem:[%s4272_s1] sm:$0xff]  ;;  %v608_v11 = vld [vmem:[%s3713_s22 + $0x10] sm:$0xff] }
  0x32   : > { %3250 = vmatprep.subr.mxu1 %v3534_v1  ;;  %2992 = vmatprep.subr.mxu0 %v3534_v1  ;;  %v607_v9 = vld [vmem:[%s3713_s22 + $0x8] sm:$0xff]  ;;  %v606_v10 = vld [vmem:[%s3713_s22] sm:$0xff]  ;;  %v619_v18 = vld [vmem:[%s4273_s2 + $0x10] sm:$0xff] }
  0x33   : > { %3258 = vmatpush3.msra.mxu1 %v615_v2  ;;  %2993 = vmatpush3.msra.mxu0 %v615_v2  ;;  %v618_v12 = vld [vmem:[%s4273_s2 + $0x8] sm:$0xff]  ;;  %v617_v14 = vld [vmem:[%s4273_s2] sm:$0xff] }
  0x34   : > { %3251 = vmatprep.subr.mxu1 %v3534_v1  ;;  %2994 = vmatprep.subr.mxu0 %v3534_v1 }
  0x35   : > { %3259 = vmatpush3.msra.mxu1 %v614_v3  ;;  %2995 = vmatpush3.msra.mxu0 %v614_v3 }
  0x36   : > { %3252 = vmatprep.subr.mxu1 %v3534_v1  ;;  %2996 = vmatprep.subr.mxu0 %v3534_v1 }
  0x37   : > { %3260 = vmatpush3.msra.mxu1 %v613_v4  ;;  %2997 = vmatpush3.msra.mxu0 %v613_v4 }
  0x38   : > { %3253 = vmatprep.subr.mxu1 %v3534_v1  ;;  %2998 = vmatprep.subr.mxu0 %v3534_v1 }
  0x39   : > { %3261 = vmatpush3.msra.mxu1 %v612_v5  ;;  %2999 = vmatpush3.msra.mxu0 %v612_v5 }
  0x3a   : > { %3254 = vmatprep.subr.mxu1 %v3534_v1  ;;  %3000 = vmatprep.subr.mxu0 %v3534_v1 }
  0x3b   : > { %3262 = vmatpush3.msra.mxu1 %v611_v6  ;;  %3001 = vmatpush3.msra.mxu0 %v611_v6 }
  0x3c   : > { %3255 = vmatprep.subr.mxu1 %v3534_v1  ;;  %3002 = vmatprep.subr.mxu0 %v3534_v1 }
  0x3d   : > { %3263 = vmatpush3.msra.mxu1 %v610_v7  ;;  %3003 = vmatpush3.msra.mxu0 %v610_v7 }
  0x3e   : > { %3256 = vmatprep.subr.mxu1 %v3534_v1  ;;  %3009 = vmatprep.mubr.msk.f32.mxu1 %vm3535_vm1, %v3534_v1 }
  0x3f   : > { %3264 = vmatpush3.msra.mxu1 %v609_v8  ;;  %3004 = vmatprep.subr.mxu0 %v3534_v1 }
  0x40   : > { %3010 = vmatmul.mubr.msk.f32.vlgmr.msra.gmra.mxu1 %vm620_vm0, %v607_v9  ;;  %3005 = vmatpush3.msra.mxu0 %v609_v8 }
  0x41   : > { %3006 = vmatprep.mubr.msk.f32.mxu0 %vm3535_vm1, %v3534_v1  ;;  %3012 = vmatprep.mubr.msk.f32.mxu1 %vm3535_vm1, %v3534_v1 }
  0x42   : > { %3007 = vmatmul.mubr.msk.f32.vlgmr.msra.gmra.mxu0 %vm620_vm0, %v606_v10 }
  0x44   : > { %3013 = vmatmul.mubr.msk.f32.gmra.mxu1 %vm620_vm0, %v608_v11 }
 0x100   : > { %v701_v13 = vpop.f32.mrf.mxu1 }
 0x101   : > { %v702_v15 = vadd.f32 %v701_v13, %v618_v12 }
 0x102   : > { %v696_v16 = vpop.f32.mrf.mxu0  ;;  %v3011_v17 = vpop.f32.mrf.mxu1 }
 0x103   : > { %712 = vst.msk [vmem:[#allocation2 + $0x8] sm:$0xff] %vm710_vm2, %v702_v15  ;;  %v697_v19 = vadd.f32 %v696_v16, %v617_v14 }
 0x104   : > { %v3008_v20 = vpop.f32.mrf.mxu0  ;;  %v706_v21 = vpop.f32.mrf.mxu1 }
 0x105   : > { %711 = vst.msk [vmem:[#allocation2] sm:$0xff] %vm710_vm2, %v697_v19  ;;  %v707_v22 = vadd.f32 %v706_v21, %v619_v18 }
 0x106   : > { %v3014_v23 = vpop.f32.mrf.mxu1 }
 0x107   : > { %713 = vst.msk [vmem:[#allocation2 + $0x10] sm:$0xff] %vm710_vm2, %v707_v22 }
 0x108 PF: > { %vm718_vm3 = vcmask 261120   ;;  %v776_v45 = vld [vmem:[%s3718_s14 + $0x18] sm:$0xff]  ;;  %v3536_v46 = vmov 0.0   ;;  %v775_v47 = vld [vmem:[%s3718_s14 + $0x10] sm:$0xff]  ;;  %vm3537_vm4 = vmmov 0   ;;  %v774_v48 = vld [vmem:[%s3718_s14 + $0x8] sm:$0xff]  ;;  %v759_v57 = vlaneseq  ;;  %s4322_s29 = scalar_lea.vmem %s4275_s4, %s3703_s18 }
 0x109   : > { %3015 = vmatprep.subr.mxu1 %v3536_v46  ;;  %3023 = vmatprep.mubr.msk.f32.mxu1 %vm3537_vm4, %v3536_v46  ;;  %v773_v49 = vld [vmem:[%s3718_s14] sm:$0xff]  ;;  %s3538_s17 = smov 96   ;;  %s3539_s10 = smov 88   ;;  %vm893_vm5 = vcmask 64512   ;;  %vm989_vm7 = vcmask 195584   ;;  %vm2444_vm10 = vcmask 523264  }
 0x10a   : > { %v715_v26 = vld [vmem:[#allocation2 + $0x8] sm:$0xff]  ;;  %3016 = vmatpush3.msra.mxu1 %v776_v45  ;;  %3047 = vmatprep.subr.mxu0 %v3536_v46  ;;  %v3808_v60 = vshrl.u32 %v759_v57, 7  ;;  %v3812_v62 = vld [vmem:[%s3729_s19] sm:$0x3f]  ;;  %s3540_s11 = smov 120   ;;  %s3542_s28 = smov 64  }
 0x10b   : > { %v722_v29 = vsel %vm718_vm3, %v715_v26, 0.0  ;;  %3017 = vmatprep.subr.mxu1 %v3536_v46  ;;  %3053 = vmatprep.mubr.msk.f32.mxu0 %vm3537_vm4, %v3536_v46  ;;  %v2817_v16 = vld [vmem:[%s4322_s29] ss:$0 sm:$0xff]  ;;  %s3543_s23 = smov 56   ;;  %s3544_s0 = smov 80  }
 0x10c   : > { %v714_v24 = vld [vmem:[#allocation2] sm:$0xff]  ;;  %3018 = vmatpush3.msra.mxu1 %v775_v47  ;;  %v761_v61 = vsub.s32 0, %v3808_v60  ;;  %v768_v63 = vsub.s32 1, %v3808_v60  ;;  %s3545_s3 = smov 112   ;;  %s3546_s21 = smov 48  }
 0x10d   : > { %v719_v27 = vsel %vm718_vm3, %v714_v24, 0.0  ;;  %3019 = vmatprep.subr.mxu1 %v3536_v46  ;;  %s3547_s24 = smov 72   ;;  %s3548_s15 = smov 104  }
 0x10e   : > { %v716_v25 = vld [vmem:[#allocation2 + $0x10] sm:$0xff]  ;;  %720 = vadd.xlane.f32.xlu0 %v719_v27  ;;  %3020 = vmatpush3.msra.mxu1 %v774_v48  ;;  %v762_v0 = vrot.slane %v3812_v62, %v761_v61  ;;  %v769_v3 = vrot.slane %v3812_v62, %v768_v63  ;;  %s3549_s27 = smov 40   ;;  %p2876_p1 = scmp.ne.s32.totalorder %s3516_s16, 1 }
 0x10f   : > { %v725_v28 = vsel %vm718_vm3, %v716_v25, 0.0  ;;  %3021 = vmatprep.subr.mxu1 %v3536_v46 }
 0x110   : > { %726 = vadd.xlane.f32.xlu1 %v725_v28  ;;  %3022 = vmatpush3.msra.mxu1 %v773_v49 }
 0x111   : > { %3032 = vmatprep.subr.mxu1 %v3536_v46 }
 0x112   : > { %723 = vadd.xlane.f32.xlu0 %v722_v29 }
 0x197   : > { %v721_v30 = vpop.xlane.xlu0 %720 }
 0x198   : > { %v729_v32 = vmul.f32 0.03125, %v721_v30 }
 0x199   : > { %v727_v31 = vpop.xlane.xlu1 %726 }
 0x19a   : > { %v731_v33 = vmul.f32 0.03125, %v727_v31  ;;  %v732_v34 = vsub.f32 %v714_v24, %v729_v32 }
 0x19b   : > { %v724_v36 = vpop.xlane.xlu0 %723 }
 0x19c   : > { %v734_v35 = vsub.f32 %v716_v25, %v731_v33  ;;  %v730_v37 = vmul.f32 0.03125, %v724_v36  ;;  %v735_v38 = vmul.f32 %v732_v34, %v732_v34  ;;  %v877_v36 = vand.u32 127, %v759_v57 }
 0x19e   : > { %v737_v39 = vmul.f32 %v734_v35, %v734_v35  ;;  %v733_v40 = vsub.f32 %v715_v26, %v730_v37  ;;  %v738_v41 = vsel %vm718_vm3, %v735_v38, 0.0  ;;  %vm878_vm6 = vcmp.lt.s32.totalorder %v877_v36, 17 }
 0x19f   : > { %739 = vadd.xlane.f32.xlu1 %v738_v41  ;;  %v3541_v37 = vmov -1e+30  }
 0x1a0   : > { %v744_v42 = vsel %vm718_vm3, %v737_v39, 0.0  ;;  %v736_v43 = vmul.f32 %v733_v40, %v733_v40  ;;  %v3889_v38 = vsel %vm878_vm6, 0.0, %v3541_v37 }
 0x1a2   : > { %v741_v44 = vsel %vm718_vm3, %v736_v43, 0.0 }
 0x1a3   : > { %745 = vadd.xlane.f32.xlu1 %v744_v42  ;;  %742 = vadd.xlane.f32.xlu0 %v741_v44 }
 0x228   : > { %v740_v50 = vpop.xlane.xlu1 %739 }
 0x229   : > { %v747_v51 = vmul.f32 0.03125, %v740_v50 }
 0x22b   : > { %v750_v52 = vadd.f32 1e-05, %v747_v51 }
 0x22c   : > { %v746_v53 = vpop.xlane.xlu1 %745  ;;  %v743_v54 = vpop.xlane.xlu0 %742 }
 0x22d   : > { %3362 = vrsqrt.f32 %v750_v52  ;;  %v749_v55 = vmul.f32 0.03125, %v746_v53  ;;  %v748_v56 = vmul.f32 0.03125, %v743_v54 }
 0x22f   : > { %v752_v58 = vadd.f32 1e-05, %v749_v55  ;;  %v751_v59 = vadd.f32 1e-05, %v748_v56 }
 0x231   : > { %3364 = vrsqrt.f32 %v752_v58 }
 0x232   : > { %3366 = vrsqrt.f32 %v751_v59 }
 0x23a   : > { %v3363_v1 = vpop.eup %3362 }
 0x23b   : > { %v756_v2 = vmul.f32 %v3363_v1, %v732_v34 }
 0x23d   : > { %v763_v4 = vmul.f32 %v762_v0, %v756_v2 }
 0x23e   : > { %v3365_v5 = vpop.eup %3364 }
 0x23f   : > { %v3367_v6 = vpop.eup %3366  ;;  %v770_v7 = vadd.f32 %v769_v3, %v763_v4  ;;  %v758_v9 = vmul.f32 %v3365_v5, %v734_v35 }
 0x240   : > { %v757_v8 = vmul.f32 %v3367_v6, %v733_v40 }
 0x241   : > { %3024 = vmatmul.mubr.msk.f32.vlgmr.msra.gmra.mxu1 %vm718_vm3, %v770_v7  ;;  %v765_v12 = vmul.f32 %v762_v0, %v758_v9 }
 0x242   : > { %3026 = vmatprep.mubr.msk.f32.mxu1 %vm3537_vm4, %v3536_v46  ;;  %v764_v10 = vmul.f32 %v762_v0, %v757_v8 }
 0x243   : > { %v772_v13 = vadd.f32 %v769_v3, %v765_v12 }
 0x244   : > { %v771_v11 = vadd.f32 %v769_v3, %v764_v10 }
 0x246   : > { %3027 = vmatmul.mubr.msk.f32.gmra.mxu1 %vm718_vm3, %v771_v11 }
 0x247   : > { %3029 = vmatprep.mubr.msk.f32.mxu1 %vm3537_vm4, %v3536_v46 }
 0x24a   : > { %3030 = vmatmul.mubr.msk.f32.gmra.mxu1 %vm718_vm3, %v772_v13 }
 0x24b   : > { %3038 = vmatprep.mubr.msk.f32.mxu1 %vm3537_vm4, %v3536_v46 }
 0x301   : > { %v859_v14 = vpop.f32.mrf.mxu1 }
 0x302   : > { %v3834_v21 = vadd.f32 %v2817_v16, %v859_v14 }
 0x303   : > { %v3025_v15 = vpop.f32.mrf.mxu1 }
 0x304   : > { %v3843_v24 = vmul.f32 0.35355338, %v3834_v21 }
 0x306   : > { %v864_v17 = vpop.f32.mrf.mxu1 }
 0x307   : > { %v3831_v18 = vadd.f32 %v2817_v16, %v864_v17 }
 0x308   : > { %v3028_v19 = vpop.f32.mrf.mxu1 }
 0x309   : > { %889 = vrot.lane.b32.xlu1 %v3831_v18, %s3538_s17  ;;  %v3848_v25 = vmul.f32 0.35355338, %v3831_v18 }
 0x30a   : > { %v869_v20 = vpop.f32.mrf.mxu1 }
 0x30b   : > { %v3836_v22 = vadd.f32 %v2817_v16, %v869_v20 }
 0x30c   : > { %v3031_v23 = vpop.f32.mrf.mxu1 }
 0x30d   : > { %887 = vrot.lane.b32.xlu1 %v3834_v21, %s3538_s17  ;;  %891 = vrot.lane.b32.xlu0 %v3836_v22, %s3538_s17  ;;  %v3851_v26 = vmul.f32 0.35355338, %v3836_v22 }
 0x311   : > { %1131 = vrot.lane.b32.xlu1 %v3836_v22, %s3539_s10  ;;  %1129 = vrot.lane.b32.xlu0 %v3831_v18, %s3539_s10 }
 0x315   : > { %1127 = vrot.lane.b32.xlu1 %v3834_v21, %s3539_s10  ;;  %1121 = vrot.lane.b32.xlu0 %v3843_v24, %s3540_s11 }
 0x319   : > { %1123 = vrot.lane.b32.xlu1 %v3848_v25, %s3540_s11  ;;  %1125 = vrot.lane.b32.xlu0 %v3851_v26, %s3540_s11  ;;  %s4323_s11 = sld [smem:[#allocation20_spill]] (!%p2876_p1) }
 0x37b   : > { %v890_v27 = vpop.permute.xlu1 %889 }
 0x37f   : > { %v892_v28 = vpop.permute.xlu0 %891  ;;  %v888_v29 = vpop.permute.xlu1 %887 }
 0x380   : > { %3033 = vmatpush3.xpose.msk.msra.mxu1 %vm893_vm5, %v892_v28 }
 0x381   : > { %3034 = vmatprep.subr.mxu1 %v3536_v46 }
 0x383   : > { %v1132_v30 = vpop.permute.xlu1 %1131  ;;  %v1130_v31 = vpop.permute.xlu0 %1129 }
 0x384   : > { %3035 = vmatpush3.xpose.msk.msra.mxu1 %vm893_vm5, %v890_v27 }
 0x385   : > { %3036 = vmatprep.subr.mxu1 %v3536_v46 }
 0x387   : > { %v1128_v32 = vpop.permute.xlu1 %1127  ;;  %v1122_v33 = vpop.permute.xlu0 %1121 }
 0x388   : > { %3037 = vmatpush3.xpose.msk.msra.mxu1 %vm893_vm5, %v888_v29 }
 0x389   : > { %3062 = vmatprep.subr.mxu1 %v3536_v46 }
 0x38b   : > { %3039 = vmatmul.mubr.msk.f32.vlgmr.msra.gmra.mxu1 %vm893_vm5, %v3843_v24  ;;  %v1124_v34 = vpop.permute.xlu1 %1123  ;;  %v1126_v35 = vpop.permute.xlu0 %1125 }
 0x38c   : > { %3063 = vmatpush3.xpose.msk.msra.mxu1 %vm893_vm5, %v1132_v30  ;;  %3041 = vmatprep.mubr.msk.f32.mxu1 %vm3537_vm4, %v3536_v46 }
 0x38d   : > { %3064 = vmatprep.subr.mxu1 %v3536_v46 }
 0x38f   : > { %3042 = vmatmul.mubr.msk.f32.gmra.mxu1 %vm893_vm5, %v3848_v25 }
 0x390   : > { %3065 = vmatpush3.xpose.msk.msra.mxu1 %vm893_vm5, %v1130_v31  ;;  %3044 = vmatprep.mubr.msk.f32.mxu1 %vm3537_vm4, %v3536_v46 }
 0x391   : > { %3066 = vmatprep.subr.mxu1 %v3536_v46 }
 0x393   : > { %3045 = vmatmul.mubr.msk.f32.gmra.mxu1 %vm893_vm5, %v3851_v26 }
 0x394   : > { %3067 = vmatpush3.xpose.msk.msra.mxu1 %vm893_vm5, %v1128_v32  ;;  %3068 = vmatprep.mubr.msk.f32.mxu1 %vm3537_vm4, %v3536_v46 }
 0x395   : > { %3092 = vmatprep.subr.mxu1 %v3536_v46 }
 0x397   : > { %3069 = vmatmul.mubr.msk.f32.vlgmr.msra.gmra.mxu1 %vm893_vm5, %v1122_v33 }
 0x398   : > { %3071 = vmatprep.mubr.msk.f32.mxu1 %vm3537_vm4, %v3536_v46 }
 0x39b   : > { %3072 = vmatmul.mubr.msk.f32.gmra.mxu1 %vm893_vm5, %v1124_v34 }
 0x39c   : > { %3074 = vmatprep.mubr.msk.f32.mxu1 %vm3537_vm4, %v3536_v46 }
 0x39f   : > { %3075 = vmatmul.mubr.msk.f32.gmra.mxu1 %vm893_vm5, %v1126_v35 }
 0x3a0   : > { %3094 = vmatprep.mubr.msk.f32.mxu1 %vm3537_vm4, %v3536_v46 }
 0x44b   : > { %v975_v39 = vpop.f32.mrf.mxu1 }
 0x44c   : > { %v976_v40 = vadd.f32 %v975_v39, %v3889_v38 }
 0x44d   : > { %v3040_v41 = vpop.f32.mrf.mxu1 }
 0x44e   : > { %v990_v42 = vsel %vm989_vm7, %v976_v40, -inf }
 0x44f   : > { %991 = vmax.xlane.f32.xlu1 %v990_v42  ;;  %v980_v43 = vpop.f32.mrf.mxu1 }
 0x450   : > { %v981_v44 = vadd.f32 %v980_v43, %v3889_v38 }
 0x451   : > { %v3043_v45 = vpop.f32.mrf.mxu1 }
 0x452   : > { %v993_v47 = vsel %vm989_vm7, %v981_v44, -inf }
 0x453   : > { %994 = vmax.xlane.f32.xlu0 %v993_v47  ;;  %v985_v48 = vpop.f32.mrf.mxu1 }
 0x454   : > { %v986_v49 = vadd.f32 %v985_v48, %v3889_v38 }
 0x455   : > { %v3046_v50 = vpop.f32.mrf.mxu1 }
 0x456   : > { %v996_v51 = vsel %vm989_vm7, %v986_v49, -inf }
 0x457   : > { %997 = vmax.xlane.f32.xlu0 %v996_v51  ;;  %v1211_v52 = vpop.f32.mrf.mxu1 }
 0x458   : > { %v1212_v53 = vadd.f32 %v1211_v52, %v3889_v38 }
 0x459   : > { %v3070_v54 = vpop.f32.mrf.mxu1 }
 0x45a   : > { %v1225_v55 = vsel %vm989_vm7, %v1212_v53, -inf }
 0x45b   : > { %1226 = vmax.xlane.f32.xlu0 %v1225_v55  ;;  %v1216_v56 = vpop.f32.mrf.mxu1 }
 0x45c   : > { %v1217_v57 = vadd.f32 %v1216_v56, %v3889_v38 }
 0x45d   : > { %v3073_v58 = vpop.f32.mrf.mxu1 }
 0x45e   : > { %v1228_v59 = vsel %vm989_vm7, %v1217_v57, -inf }
 0x45f   : > { %1229 = vmax.xlane.f32.xlu1 %v1228_v59  ;;  %v1221_v61 = vpop.f32.mrf.mxu1 }
 0x460   : > { %v1222_v63 = vadd.f32 %v1221_v61, %v3889_v38 }
 0x461   : > { %v3076_v0 = vpop.f32.mrf.mxu1 }
 0x462   : > { %v1231_v1 = vsel %vm989_vm7, %v1222_v63, -inf }
 0x463   : > { %1232 = vmax.xlane.f32.xlu0 %v1231_v1 }
 0x470   : > { %1027 = vrot.lane.b32.xlu1 %v3836_v22, %s3542_s28 }
 0x474   : > { %1023 = vrot.lane.b32.xlu1 %v3834_v21, %s3542_s28 }
 0x478   : > { %1262 = vrot.lane.b32.xlu1 %v3836_v22, %s3543_s23 }
 0x479   : > { %1025 = vrot.lane.b32.xlu0 %v3831_v18, %s3542_s28 }
 0x4d8   : > { %v992_v2 = vpop.xlane.xlu1 %991 }
 0x4d9   : > { %v999_v3 = vsub.f32 %v976_v40, %v992_v2  ;;  %v880_v2 = vld [vmem:[%s3723_s13] sm:$0xff] }
 0x4db   : > { %v1002_v4 = vmul.f32 1.442695, %v999_v3  ;;  %v881_v3 = vld [vmem:[%s3723_s13 + $0x8] sm:$0xff] }
 0x4dc   : > { %v995_v5 = vpop.xlane.xlu0 %994  ;;  %3093 = vmatpush3.msra.mxu1 %v881_v3 }
 0x4dd   : > { %3368 = vpow2.f32 %v1002_v4  ;;  %v1000_v6 = vsub.f32 %v981_v44, %v995_v5  ;;  %3114 = vmatprep.subr.mxu1 %v3536_v46 }
 0x4df   : > { %v1004_v7 = vmul.f32 1.442695, %v1000_v6 }
 0x4e0   : > { %v998_v8 = vpop.xlane.xlu0 %997 }
 0x4e1   : > { %3370 = vpow2.f32 %v1004_v7  ;;  %v1001_v9 = vsub.f32 %v986_v49, %v998_v8 }
 0x4e3   : > { %v1006_v10 = vmul.f32 1.442695, %v1001_v9 }
 0x4e4   : > { %v1227_v11 = vpop.xlane.xlu0 %1226 }
 0x4e5   : > { %3372 = vpow2.f32 %v1006_v10  ;;  %v1234_v12 = vsub.f32 %v1212_v53, %v1227_v11 }
 0x4e7   : > { %v1237_v13 = vmul.f32 1.442695, %v1234_v12 }
 0x4e8   : > { %v1230_v14 = vpop.xlane.xlu1 %1229 }
 0x4e9   : > { %3374 = vpow2.f32 %v1237_v13  ;;  %v1235_v15 = vsub.f32 %v1217_v57, %v1230_v14 }
 0x4ea   : > { %v3369_v16 = vpop.eup %3368 }
 0x4eb   : > { %v1239_v17 = vmul.f32 1.442695, %v1235_v15  ;;  %v1008_v19 = vsel %vm989_vm7, %v3369_v16, 0.0 }
 0x4ec   : > { %1009 = vadd.xlane.f32.xlu1 %v1008_v19  ;;  %v1028_v20 = vpop.permute.xlu1 %1027  ;;  %v1233_v23 = vpop.xlane.xlu0 %1232 }
 0x4ed   : > { %3376 = vpow2.f32 %v1239_v17  ;;  %v1236_v27 = vsub.f32 %v1222_v63, %v1233_v23  ;;  %3048 = vmatpush3.msra.mxu0 %v1028_v20 }
 0x4ee   : > { %v3371_v28 = vpop.eup %3370  ;;  %3049 = vmatprep.subr.mxu0 %v3536_v46 }
 0x4ef   : > { %v1241_v29 = vmul.f32 1.442695, %v1236_v27  ;;  %v1011_v30 = vsel %vm989_vm7, %v3371_v28, 0.0 }
 0x4f0   : > { %1012 = vadd.xlane.f32.xlu0 %v1011_v30  ;;  %v1026_v31 = vpop.permute.xlu0 %1025  ;;  %v1024_v33 = vpop.permute.xlu1 %1023 }
 0x4f1   : > { %3378 = vpow2.f32 %v1241_v29  ;;  %3050 = vmatpush3.msra.mxu0 %v1026_v31 }
 0x4f2   : > { %v3373_v32 = vpop.eup %3372  ;;  %3051 = vmatprep.subr.mxu0 %v3536_v46 }
 0x4f3   : > { %3052 = vmatpush3.msra.mxu0 %v1024_v33  ;;  %v1014_v34 = vsel %vm989_vm7, %v3373_v32, 0.0 }
 0x4f4   : > { %1015 = vadd.xlane.f32.xlu1 %v1014_v34  ;;  %3077 = vmatprep.subr.mxu0 %v3536_v46  ;;  %v1263_v42 = vpop.permute.xlu1 %1262 }
 0x4f6   : > { %v3375_v35 = vpop.eup %3374 }
 0x4f7   : > { %v1243_v36 = vsel %vm989_vm7, %v3375_v35, 0.0 }
 0x4f8   : > { %1244 = vadd.xlane.f32.xlu0 %v1243_v36 }
 0x4fa   : > { %v3377_v37 = vpop.eup %3376 }
 0x4fb   : > { %v1246_v39 = vsel %vm989_vm7, %v3377_v37, 0.0 }
 0x4fc   : > { %1247 = vadd.xlane.f32.xlu1 %v1246_v39 }
 0x4fe   : > { %v3379_v40 = vpop.eup %3378 }
 0x4ff   : > { %v1249_v41 = vsel %vm989_vm7, %v3379_v40, 0.0 }
 0x500   : > { %1250 = vadd.xlane.f32.xlu0 %v1249_v41 }
 0x50d   : > { %1260 = vrot.lane.b32.xlu1 %v3831_v18, %s3543_s23 }
 0x511   : > { %1544 = vrot.lane.b32.xlu1 %v3836_v22, %s3544_s0 }
 0x515   : > { %1540 = vrot.lane.b32.xlu1 %v3834_v21, %s3544_s0 }
 0x516   : > { %1258 = vrot.lane.b32.xlu0 %v3834_v21, %s3543_s23 }
 0x519   : > { %1536 = vrot.lane.b32.xlu1 %v3848_v25, %s3545_s3 }
 0x51a   : > { %1542 = vrot.lane.b32.xlu0 %v3831_v18, %s3544_s0  ;;  %s4324_s0 = sld [smem:[#allocation21_spill]] (!%p2876_p1) }
 0x51e   : > { %1534 = vrot.lane.b32.xlu0 %v3843_v24, %s3545_s3 }
 0x522   : > { %1538 = vrot.lane.b32.xlu0 %v3851_v26, %s3545_s3 }
 0x575   : > { %v1010_v43 = vpop.xlane.xlu1 %1009 }
 0x576   : > { %3380 = vrcp.f32 %v1010_v43 }
 0x579   : > { %v1013_v44 = vpop.xlane.xlu0 %1012 }
 0x57a   : > { %3382 = vrcp.f32 %v1013_v44 }
 0x57d   : > { %v1016_v45 = vpop.xlane.xlu1 %1015 }
 0x57e   : > { %3384 = vrcp.f32 %v1016_v45 }
 0x581   : > { %v1245_v47 = vpop.xlane.xlu0 %1244 }
 0x582   : > { %3386 = vrcp.f32 %v1245_v47 }
 0x583   : > { %v3381_v48 = vpop.eup %3380 }
 0x584   : > { %v1020_v49 = vmul.f32 %v3381_v48, %v3369_v16 }
 0x585   : > { %v1248_v50 = vpop.xlane.xlu1 %1247 }
 0x586   : > { %3388 = vrcp.f32 %v1248_v50  ;;  %3054 = vmatmul.mubr.msk.f32.vlgmr.msra.gmra.mxu0 %vm989_vm7, %v1020_v49 }
 0x587   : > { %v3383_v51 = vpop.eup %3382  ;;  %3078 = vmatpush3.msra.mxu0 %v1263_v42  ;;  %3056 = vmatprep.mubr.msk.f32.mxu0 %vm3537_vm4, %v3536_v46 }
 0x588   : > { %3079 = vmatprep.subr.mxu0 %v3536_v46  ;;  %v1021_v52 = vmul.f32 %v3383_v51, %v3371_v28 }
 0x589   : > { %v1261_v53 = vpop.permute.xlu1 %1260  ;;  %v1251_v54 = vpop.xlane.xlu0 %1250 }
 0x58a   : > { %3390 = vrcp.f32 %v1251_v54  ;;  %3057 = vmatmul.mubr.msk.f32.gmra.mxu0 %vm989_vm7, %v1021_v52 }
 0x58b   : > { %v3385_v55 = vpop.eup %3384  ;;  %3080 = vmatpush3.msra.mxu0 %v1261_v53  ;;  %3059 = vmatprep.mubr.msk.f32.mxu0 %vm3537_vm4, %v3536_v46 }
 0x58c   : > { %3081 = vmatprep.subr.mxu0 %v3536_v46  ;;  %v1022_v56 = vmul.f32 %v3385_v55, %v3373_v32 }
 0x58d   : > { %v1259_v57 = vpop.permute.xlu0 %1258  ;;  %v1545_v11 = vpop.permute.xlu1 %1544 }
 0x58e   : > { %3060 = vmatmul.mubr.msk.f32.gmra.mxu0 %vm989_vm7, %v1022_v56 }
 0x58f   : > { %v3387_v58 = vpop.eup %3386  ;;  %3082 = vmatpush3.msra.mxu0 %v1259_v57  ;;  %3083 = vmatprep.mubr.msk.f32.mxu0 %vm3537_vm4, %v3536_v46 }
 0x590   : > { %v1255_v59 = vmul.f32 %v3387_v58, %v3375_v35  ;;  %3103 = vmatprep.subr.mxu0 %v3536_v46 }
 0x591   : > { %v1543_v14 = vpop.permute.xlu0 %1542  ;;  %v1541_v17 = vpop.permute.xlu1 %1540 }
 0x592   : > { %3084 = vmatmul.mubr.msk.f32.vlgmr.msra.gmra.mxu0 %vm989_vm7, %v1255_v59 }
 0x593   : > { %v3389_v61 = vpop.eup %3388  ;;  %3086 = vmatprep.mubr.msk.f32.mxu0 %vm3537_vm4, %v3536_v46  ;;  %3104 = vmatpush3.msra.mxu0 %v880_v2 }
 0x594   : > { %v1256_v63 = vmul.f32 %v3389_v61, %v3377_v37  ;;  %3129 = vmatprep.subr.mxu0 %v3536_v46 }
 0x595   : > { %v1535_v20 = vpop.permute.xlu0 %1534  ;;  %v1537_v23 = vpop.permute.xlu1 %1536 }
 0x596   : > { %3087 = vmatmul.mubr.msk.f32.gmra.mxu0 %vm989_vm7, %v1256_v63 }
 0x597   : > { %v3391_v0 = vpop.eup %3390  ;;  %3089 = vmatprep.mubr.msk.f32.mxu0 %vm3537_vm4, %v3536_v46 }
 0x598   : > { %v1257_v1 = vmul.f32 %v3391_v0, %v3379_v40 }
 0x599   : > { %v1539_v27 = vpop.permute.xlu0 %1538 }
 0x59a   : > { %3090 = vmatmul.mubr.msk.f32.gmra.mxu0 %vm989_vm7, %v1257_v1 }
 0x59b   : > { %3105 = vmatprep.mubr.msk.f32.mxu0 %vm3537_vm4, %v3536_v46 }
 0x646   : > { %v1107_v4 = vpop.f32.mrf.mxu0 }
 0x647   : > { %3106 = vmatmul.mubr.msk.f32.vlgmr.msra.gmra.mxu0 %vm893_vm5, %v1107_v4 }
 0x648   : > { %v3055_v5 = vpop.f32.mrf.mxu0  ;;  %3108 = vmatprep.mubr.msk.f32.mxu0 %vm3537_vm4, %v3536_v46 }
 0x64a   : > { %v1112_v6 = vpop.f32.mrf.mxu0 }
 0x64b   : > { %3109 = vmatmul.mubr.msk.f32.gmra.mxu0 %vm893_vm5, %v1112_v6 }
 0x64c   : > { %v3058_v7 = vpop.f32.mrf.mxu0  ;;  %3111 = vmatprep.mubr.msk.f32.mxu0 %vm3537_vm4, %v3536_v46 }
 0x64e   : > { %v1117_v8 = vpop.f32.mrf.mxu0 }
 0x64f   : > { %3112 = vmatmul.mubr.msk.f32.gmra.mxu0 %vm893_vm5, %v1117_v8 }
 0x650   : > { %v3061_v9 = vpop.f32.mrf.mxu0  ;;  %3135 = vmatprep.mubr.msk.f32.mxu0 %vm3537_vm4, %v3536_v46 }
 0x652   : > { %v1342_v10 = vpop.f32.mrf.mxu0 }
 0x653   : > { %3095 = vmatmul.mubr.msk.f32.vlgmr.msra.gmra.mxu1 %vm893_vm5, %v1342_v10 }
 0x654   : > { %3115 = vmatpush3.xpose.msk.msra.mxu1 %vm893_vm5, %v1545_v11  ;;  %v3085_v12 = vpop.f32.mrf.mxu0  ;;  %3097 = vmatprep.mubr.msk.f32.mxu1 %vm3537_vm4, %v3536_v46 }
 0x655   : > { %3116 = vmatprep.subr.mxu1 %v3536_v46 }
 0x656   : > { %v1347_v13 = vpop.f32.mrf.mxu0 }
 0x657   : > { %3098 = vmatmul.mubr.msk.f32.gmra.mxu1 %vm893_vm5, %v1347_v13 }
 0x658   : > { %3117 = vmatpush3.xpose.msk.msra.mxu1 %vm893_vm5, %v1543_v14  ;;  %v3088_v15 = vpop.f32.mrf.mxu0  ;;  %3100 = vmatprep.mubr.msk.f32.mxu1 %vm3537_vm4, %v3536_v46 }
 0x659   : > { %3118 = vmatprep.subr.mxu1 %v3536_v46 }
 0x65a   : > { %v1352_v16 = vpop.f32.mrf.mxu0 }
 0x65b   : > { %3101 = vmatmul.mubr.msk.f32.gmra.mxu1 %vm893_vm5, %v1352_v16 }
 0x65c   : > { %3119 = vmatpush3.xpose.msk.msra.mxu1 %vm893_vm5, %v1541_v17  ;;  %v3091_v19 = vpop.f32.mrf.mxu0  ;;  %3120 = vmatprep.mubr.msk.f32.mxu1 %vm3537_vm4, %v3536_v46 }
 0x65d   : > { %3144 = vmatprep.subr.mxu1 %v3536_v46 }
 0x65f   : > { %3121 = vmatmul.mubr.msk.f32.vlgmr.msra.gmra.mxu1 %vm893_vm5, %v1535_v20 }
 0x660   : > { %3123 = vmatprep.mubr.msk.f32.mxu1 %vm3537_vm4, %v3536_v46 }
 0x663   : > { %3124 = vmatmul.mubr.msk.f32.gmra.mxu1 %vm893_vm5, %v1537_v23 }
 0x664   : > { %3126 = vmatprep.mubr.msk.f32.mxu1 %vm3537_vm4, %v3536_v46 }
 0x667   : > { %3127 = vmatmul.mubr.msk.f32.gmra.mxu1 %vm893_vm5, %v1539_v27 }
 0x668   : > { %3146 = vmatprep.mubr.msk.f32.mxu1 %vm3537_vm4, %v3536_v46 }
 0x707   : > { %v1520_v28 = vpop.f32.mrf.mxu0 }
 0x709   : > { %v3107_v29 = vpop.f32.mrf.mxu0 }
 0x70b   : > { %v1525_v30 = vpop.f32.mrf.mxu0 }
 0x70d   : > { %v3110_v31 = vpop.f32.mrf.mxu0 }
 0x70e   : > { %v882_v31 = vld [vmem:[%s3723_s13 + $0x10] sm:$0xff] }
 0x70f   : > { %v1530_v32 = vpop.f32.mrf.mxu0  ;;  %3145 = vmatpush3.msra.mxu1 %v882_v31 }
 0x710   : > { %3265 = vmatprep.subr.mxu1 %v3536_v46 }
 0x711   : > { %v3113_v33 = vpop.f32.mrf.mxu0 }
 0x713   : > { %v1431_v34 = vpop.f32.mrf.mxu1 }
 0x714   : > { %v3985_v35 = vadd.f32 %v1520_v28, %v1431_v34 }
 0x715   : > { %v3096_v36 = vpop.f32.mrf.mxu1 }
 0x717   : > { %v1436_v37 = vpop.f32.mrf.mxu1 }
 0x718   : > { %v3987_v39 = vadd.f32 %v1525_v30, %v1436_v37 }
 0x719   : > { %v3099_v40 = vpop.f32.mrf.mxu1 }
 0x71b   : > { %v1441_v41 = vpop.f32.mrf.mxu1 }
 0x71c   : > { %v3989_v42 = vadd.f32 %v1530_v32, %v1441_v41 }
 0x71d   : > { %v3102_v43 = vpop.f32.mrf.mxu1 }
 0x71f   : > { %v1624_v44 = vpop.f32.mrf.mxu1 }
 0x720   : > { %v1625_v45 = vadd.f32 %v1624_v44, %v3889_v38 }
 0x721   : > { %v3122_v47 = vpop.f32.mrf.mxu1 }
 0x722   : > { %v1638_v48 = vsel %vm989_vm7, %v1625_v45, -inf }
 0x723   : > { %1639 = vmax.xlane.f32.xlu1 %v1638_v48  ;;  %v1629_v49 = vpop.f32.mrf.mxu1 }
 0x724   : > { %v1630_v50 = vadd.f32 %v1629_v49, %v3889_v38 }
 0x725   : > { %v3125_v51 = vpop.f32.mrf.mxu1 }
 0x726   : > { %v1641_v52 = vsel %vm989_vm7, %v1630_v50, -inf }
 0x727   : > { %1642 = vmax.xlane.f32.xlu0 %v1641_v52  ;;  %v1634_v53 = vpop.f32.mrf.mxu1 }
 0x728   : > { %v1635_v54 = vadd.f32 %v1634_v53, %v3889_v38 }
 0x729   : > { %v3128_v55 = vpop.f32.mrf.mxu1 }
 0x72a   : > { %v1644_v56 = vsel %vm989_vm7, %v1635_v54, -inf }
 0x72b   : > { %1645 = vmax.xlane.f32.xlu0 %v1644_v56 }
 0x734   : > { %1675 = vrot.lane.b32.xlu1 %v3836_v22, %s3546_s21 }
 0x738   : > { %1671 = vrot.lane.b32.xlu1 %v3834_v21, %s3546_s21 }
 0x73c   : > { %1871 = vrot.lane.b32.xlu1 %v3836_v22, %s3547_s24 }
 0x740   : > { %1869 = vrot.lane.b32.xlu1 %v3831_v18, %s3547_s24 }
 0x7ac   : > { %v1640_v57 = vpop.xlane.xlu1 %1639 }
 0x7ad   : > { %v1647_v58 = vsub.f32 %v1625_v45, %v1640_v57 }
 0x7af   : > { %v1650_v59 = vmul.f32 1.442695, %v1647_v58 }
 0x7b0   : > { %v1676_v61 = vpop.permute.xlu1 %1675  ;;  %v1643_v63 = vpop.xlane.xlu0 %1642 }
 0x7b1   : > { %3392 = vpow2.f32 %v1650_v59  ;;  %v1648_v0 = vsub.f32 %v1630_v50, %v1643_v63  ;;  %3130 = vmatpush3.msra.mxu0 %v1676_v61 }
 0x7b2   : > { %3131 = vmatprep.subr.mxu0 %v3536_v46 }
 0x7b3   : > { %v1652_v1 = vmul.f32 1.442695, %v1648_v0 }
 0x7b4   : > { %v1646_v6 = vpop.xlane.xlu0 %1645  ;;  %v1672_v11 = vpop.permute.xlu1 %1671 }
 0x7b5   : > { %3394 = vpow2.f32 %v1652_v1  ;;  %v1649_v7 = vsub.f32 %v1635_v54, %v1646_v6 }
 0x7b7   : > { %v1654_v8 = vmul.f32 1.442695, %v1649_v7 }
 0x7b8   : > { %v1872_v12 = vpop.permute.xlu1 %1871 }
 0x7b9   : > { %3396 = vpow2.f32 %v1654_v8 }
 0x7be   : > { %v3393_v2 = vpop.eup %3392 }
 0x7bf   : > { %v1656_v3 = vsel %vm989_vm7, %v3393_v2, 0.0 }
 0x7c0   : > { %1657 = vadd.xlane.f32.xlu0 %v1656_v3 }
 0x7c2   : > { %v3395_v4 = vpop.eup %3394 }
 0x7c3   : > { %v1659_v5 = vsel %vm989_vm7, %v3395_v4, 0.0 }
 0x7c4   : > { %1660 = vadd.xlane.f32.xlu1 %v1659_v5 }
 0x7c6   : > { %v3397_v9 = vpop.eup %3396 }
 0x7c7   : > { %v1662_v10 = vsel %vm989_vm7, %v3397_v9, 0.0 }
 0x7d5   : > { %1861 = vrot.lane.b32.xlu1 %v3843_v24, %s3548_s15  ;;  %v1870_v24 = vpop.permute.xlu1 %1869 }
 0x7d6   : > { %1673 = vrot.lane.b32.xlu0 %v3831_v18, %s3546_s21 }
 0x7d9   : > { %1865 = vrot.lane.b32.xlu1 %v3851_v26, %s3548_s15 }
 0x7f5   : > { %1663 = vadd.xlane.f32.xlu0 %v1662_v10 }
 0x80b   : > { %1867 = vrot.lane.b32.xlu0 %v3834_v21, %s3547_s24  ;;  %s4325_s24 = sld [smem:[#allocation22_spill]] (!%p2876_p1) }
 0x80f   : > { %1863 = vrot.lane.b32.xlu0 %v3848_v25, %s3548_s15 }
 0x849   : > { %v1658_v13 = vpop.xlane.xlu0 %1657 }
 0x84a   : > { %3398 = vrcp.f32 %v1658_v13 }
 0x84d   : > { %v1661_v14 = vpop.xlane.xlu1 %1660  ;;  %v1674_v15 = vpop.permute.xlu0 %1673 }
 0x84e   : > { %3400 = vrcp.f32 %v1661_v14  ;;  %3132 = vmatpush3.msra.mxu0 %v1674_v15 }
 0x84f   : > { %3133 = vmatprep.subr.mxu0 %v3536_v46 }
 0x850   : > { %3134 = vmatpush3.msra.mxu0 %v1672_v11 }
 0x851   : > { %3155 = vmatprep.subr.mxu0 %v3536_v46  ;;  %v1862_v28 = vpop.permute.xlu1 %1861 }
 0x855   : > { %v1866_v30 = vpop.permute.xlu1 %1865 }
 0x857   : > { %v3399_v26 = vpop.eup %3398 }
 0x858   : > { %v1668_v16 = vmul.f32 %v3399_v26, %v3393_v2 }
 0x85a   : > { %3136 = vmatmul.mubr.msk.f32.vlgmr.msra.gmra.mxu0 %vm989_vm7, %v1668_v16 }
 0x85b   : > { %v3401_v17 = vpop.eup %3400  ;;  %3156 = vmatpush3.xpose.msk.msra.mxu0 %vm893_vm5, %v1872_v12  ;;  %3138 = vmatprep.mubr.msk.f32.mxu0 %vm3537_vm4, %v3536_v46 }
 0x85c   : > { %3157 = vmatprep.subr.mxu0 %v3536_v46  ;;  %v1669_v25 = vmul.f32 %v3401_v17, %v3395_v4 }
 0x85e   : > { %3139 = vmatmul.mubr.msk.f32.gmra.mxu0 %vm989_vm7, %v1669_v25 }
 0x85f   : > { %3158 = vmatpush3.xpose.msk.msra.mxu0 %vm893_vm5, %v1870_v24  ;;  %3141 = vmatprep.mubr.msk.f32.mxu0 %vm3537_vm4, %v3536_v46 }
 0x860   : > { %3159 = vmatprep.subr.mxu0 %v3536_v46 }
 0x87e   : > { %v1664_v19 = vpop.xlane.xlu0 %1663 }
 0x87f   : > { %3402 = vrcp.f32 %v1664_v19 }
 0x882   : > { %v1868_v20 = vpop.permute.xlu0 %1867 }
 0x883   : > { %3160 = vmatpush3.xpose.msk.msra.mxu0 %vm893_vm5, %v1868_v20  ;;  %v883_v20 = vld [vmem:[%s3723_s13 + $0x18] sm:$0xff] }
 0x884   : > { %3170 = vmatprep.subr.mxu0 %v3536_v46 }
 0x886   : > { %v1864_v29 = vpop.permute.xlu0 %1863 }
 0x88c   : > { %v3403_v23 = vpop.eup %3402 }
 0x88d   : > { %v1670_v27 = vmul.f32 %v3403_v23, %v3397_v9 }
 0x88f   : > { %3142 = vmatmul.mubr.msk.f32.gmra.mxu0 %vm989_vm7, %v1670_v27 }
 0x890   : > { %3161 = vmatprep.mubr.msk.f32.mxu0 %vm3537_vm4, %v3536_v46 }
 0x893   : > { %3162 = vmatmul.mubr.msk.f32.vlgmr.msra.gmra.mxu0 %vm893_vm5, %v1862_v28 }
 0x894   : > { %3164 = vmatprep.mubr.msk.f32.mxu0 %vm3537_vm4, %v3536_v46 }
 0x897   : > { %3165 = vmatmul.mubr.msk.f32.gmra.mxu0 %vm893_vm5, %v1864_v29 }
 0x898   : > { %3167 = vmatprep.mubr.msk.f32.mxu0 %vm3537_vm4, %v3536_v46 }
 0x89b   : > { %3168 = vmatmul.mubr.msk.f32.gmra.mxu0 %vm893_vm5, %v1866_v30 }
 0x89c   : > { %3176 = vmatprep.mubr.msk.f32.mxu0 %vm3537_vm4, %v3536_v46 }
 0x91a   : > { %v1755_v32 = vpop.f32.mrf.mxu0 }
 0x91b   : > { %3147 = vmatmul.mubr.msk.f32.vlgmr.msra.gmra.mxu1 %vm893_vm5, %v1755_v32  ;;  %v2193_v32 = vsub.s32 4, %v3808_v60 }
 0x91c   : > { %v3137_v33 = vpop.f32.mrf.mxu0  ;;  %3149 = vmatprep.mubr.msk.f32.mxu1 %vm3537_vm4, %v3536_v46 }
 0x91e   : > { %v1760_v34 = vpop.f32.mrf.mxu0 }
 0x91f   : > { %3150 = vmatmul.mubr.msk.f32.gmra.mxu1 %vm893_vm5, %v1760_v34 }
 0x920   : > { %v3140_v36 = vpop.f32.mrf.mxu0  ;;  %3152 = vmatprep.mubr.msk.f32.mxu1 %vm3537_vm4, %v3536_v46 }
 0x921   : > { %v2194_v36 = vrot.slane %v3812_v62, %v2193_v32 }
 0x94f   : > { %v1765_v37 = vpop.f32.mrf.mxu0 }
 0x950   : > { %3153 = vmatmul.mubr.msk.f32.gmra.mxu1 %vm893_vm5, %v1765_v37 }
 0x951   : > { %v3143_v40 = vpop.f32.mrf.mxu0  ;;  %3179 = vmatprep.mubr.msk.f32.mxu1 %vm3537_vm4, %v3536_v46 }
 0x952   : > { %v3434_v40 = vld [vmem:[#allocation2] sm:$0xff] }
 0x953   : > { %v1951_v41 = vpop.f32.mrf.mxu0 }
 0x954   : > { %v1952_v43 = vadd.f32 %v1951_v41, %v3889_v38 }
 0x955   : > { %v3163_v44 = vpop.f32.mrf.mxu0 }
 0x956   : > { %v1965_v45 = vsel %vm989_vm7, %v1952_v43, -inf }
 0x957   : > { %1966 = vmax.xlane.f32.xlu0 %v1965_v45  ;;  %v1956_v47 = vpop.f32.mrf.mxu0 }
 0x958   : > { %v1957_v48 = vadd.f32 %v1956_v47, %v3889_v38 }
 0x959   : > { %v3166_v49 = vpop.f32.mrf.mxu0 }
 0x95a   : > { %v1968_v50 = vsel %vm989_vm7, %v1957_v48, -inf }
 0x95b   : > { %1969 = vmax.xlane.f32.xlu1 %v1968_v50  ;;  %v1961_v51 = vpop.f32.mrf.mxu0 }
 0x95c   : > { %v1962_v52 = vadd.f32 %v1961_v51, %v3889_v38 }
 0x95d   : > { %v3169_v53 = vpop.f32.mrf.mxu0 }
 0x95e   : > { %v1971_v54 = vsel %vm989_vm7, %v1962_v52, -inf }
 0x95f   : > { %1972 = vmax.xlane.f32.xlu0 %v1971_v54  ;;  %v3436_v54 = vld [vmem:[#allocation2 + $0x10] sm:$0xff] }
 0x96c   : > { %2000 = vrot.lane.b32.xlu1 %v3831_v18, %s3549_s27 }
 0x9db   : > { %v1844_v55 = vpop.f32.mrf.mxu1 }
 0x9dc   : > { %v4058_v56 = vadd.f32 %v1844_v55, %v3985_v35 }
 0x9dd   : > { %v3148_v57 = vpop.f32.mrf.mxu1 }
 0x9df   : > { %v1849_v58 = vpop.f32.mrf.mxu1 }
 0x9e0   : > { %v4061_v59 = vadd.f32 %v1849_v58, %v3987_v39  ;;  %v1967_v61 = vpop.xlane.xlu0 %1966 }
 0x9e1   : > { %v1974_v63 = vsub.f32 %v1952_v43, %v1967_v61  ;;  %v3151_v0 = vpop.f32.mrf.mxu1 }
 0x9e3   : > { %v1977_v38 = vmul.f32 1.442695, %v1974_v63 }
 0x9e4   : > { %v1970_v1 = vpop.xlane.xlu1 %1969 }
 0x9e5   : > { %3404 = vpow2.f32 %v1977_v38  ;;  %v1975_v2 = vsub.f32 %v1957_v48, %v1970_v1  ;;  %v3435_v48 = vld [vmem:[#allocation2 + $0x8] sm:$0xff] }
 0x9e7   : > { %v1979_v3 = vmul.f32 1.442695, %v1975_v2 }
 0x9e8   : > { %v1973_v4 = vpop.xlane.xlu0 %1972  ;;  %v2001_v13 = vpop.permute.xlu1 %2000 }
 0x9e9   : > { %3406 = vpow2.f32 %v1979_v3  ;;  %v1976_v18 = vsub.f32 %v1962_v52, %v1973_v4 }
 0x9eb   : > { %v1981_v5 = vmul.f32 1.442695, %v1976_v18 }
 0x9ed   : > { %3408 = vpow2.f32 %v1981_v5 }
 0x9f2   : > { %v3405_v35 = vpop.eup %3404 }
 0x9f3   : > { %v1983_v6 = vsel %vm989_vm7, %v3405_v35, 0.0 }
 0x9f4   : > { %1984 = vadd.xlane.f32.xlu0 %v1983_v6 }
 0x9f6   : > { %v3407_v7 = vpop.eup %3406 }
 0x9f7   : > { %v1986_v39 = vsel %vm989_vm7, %v3407_v7, 0.0 }
 0x9f8   : > { %1987 = vadd.xlane.f32.xlu0 %v1986_v39 }
 0x9fa   : > { %v3409_v8 = vpop.eup %3408 }
 0x9fb   : > { %v1989_v9 = vsel %vm989_vm7, %v3409_v8, 0.0 }
 0x9fc   : > { %1990 = vadd.xlane.f32.xlu1 %v1989_v9  ;;  %v2253_v9 = vld [vmem:[%s3734_s26 + $0x10] sm:$0xff] }
 0xa0d   : > { %1998 = vrot.lane.b32.xlu1 %v3834_v21, %s3549_s27 }
 0xa0e   : > { %2002 = vrot.lane.b32.xlu0 %v3836_v22, %s3549_s27 }
 0xa10   : > { %v1854_v10 = vpop.f32.mrf.mxu1 }
 0xa11   : > { %v4069_v11 = vadd.f32 %v1854_v10, %v3989_v42  ;;  %v2252_v10 = vld [vmem:[%s3734_s26 + $0x8] sm:$0xff] }
 0xa12   : > { %v3154_v12 = vpop.f32.mrf.mxu1 }
 0xa7d   : > { %v1985_v24 = vpop.xlane.xlu0 %1984 }
 0xa7e   : > { %3410 = vrcp.f32 %v1985_v24 }
 0xa81   : > { %v1988_v14 = vpop.xlane.xlu0 %1987 }
 0xa82   : > { %3412 = vrcp.f32 %v1988_v14 }
 0xa85   : > { %v1991_v15 = vpop.xlane.xlu1 %1990  ;;  %v2003_v26 = vpop.permute.xlu0 %2002 }
 0xa86   : > { %3414 = vrcp.f32 %v1991_v15  ;;  %3171 = vmatpush3.msra.mxu0 %v2003_v26  ;;  %3268 = vmatpush3.msra.mxu1 %v2003_v26 }
 0xa87   : > { %3172 = vmatprep.subr.mxu0 %v3536_v46  ;;  %3266 = vmatprep.subr.mxu1 %v3536_v46 }
 0xa88   : > { %3173 = vmatpush3.msra.mxu0 %v2001_v13  ;;  %3269 = vmatpush3.msra.mxu1 %v2001_v13 }
 0xa89   : > { %v1999_v21 = vpop.permute.xlu1 %1998  ;;  %3174 = vmatprep.subr.mxu0 %v3536_v46  ;;  %3267 = vmatprep.subr.mxu1 %v3536_v46 }
 0xa8a   : > { %3175 = vmatpush3.msra.mxu0 %v1999_v21  ;;  %3270 = vmatpush3.msra.mxu1 %v1999_v21 }
 0xa8b   : > { %v3411_v22 = vpop.eup %3410  ;;  %3185 = vmatprep.subr.mxu0 %v3536_v46  ;;  %3196 = vmatprep.subr.mxu1 %v3536_v46 }
 0xa8c   : > { %v1995_v42 = vmul.f32 %v3411_v22, %v3405_v35 }
 0xa8e   : > { %3177 = vmatmul.mubr.msk.f32.vlgmr.msra.gmra.mxu0 %vm989_vm7, %v1995_v42 }
 0xa8f   : > { %v3413_v16 = vpop.eup %3412  ;;  %3187 = vmatprep.mubr.msk.f32.mxu0 %vm3537_vm4, %v3536_v46  ;;  %3186 = vmatpush3.msra.mxu0 %v883_v20 }
 0xa90   : > { %v1996_v17 = vmul.f32 %v3413_v16, %v3407_v7  ;;  %3213 = vmatprep.subr.mxu0 %v3536_v46  ;;  %v2239_v16 = vsub.s32 2, %v3808_v60 }
 0xa92   : > { %3180 = vmatmul.mubr.msk.f32.vlgmr.msra.gmra.mxu1 %vm989_vm7, %v1996_v17  ;;  %v2246_v17 = vsub.s32 3, %v3808_v60 }
 0xa93   : > { %v3415_v25 = vpop.eup %3414  ;;  %3182 = vmatprep.mubr.msk.f32.mxu1 %vm3537_vm4, %v3536_v46 }
 0xa94   : > { %v1997_v19 = vmul.f32 %v3415_v25, %v3409_v8  ;;  %v2254_v8 = vld [vmem:[%s3734_s26 + $0x18] sm:$0xff]  ;;  %v4130_v25 = vld [vmem:[%s3729_s19] sm:$0x3f] }
 0xa95   : > { %3197 = vmatpush3.msra.mxu1 %v2254_v8 }
 0xa96   : > { %3183 = vmatmul.mubr.msk.f32.gmra.mxu1 %vm989_vm7, %v1997_v19  ;;  %3198 = vmatprep.subr.mxu1 %v3536_v46  ;;  %v2240_v19 = vrot.slane %v4130_v25, %v2239_v16 }
 0xa97   : > { %3204 = vmatprep.mubr.msk.f32.mxu1 %vm3537_vm4, %v3536_v46  ;;  %3199 = vmatpush3.msra.mxu1 %v2253_v9 }
 0xa98   : > { %3200 = vmatprep.subr.mxu1 %v3536_v46 }
 0xa99   : > { %3201 = vmatpush3.msra.mxu1 %v2252_v10 }
 0xa9a   : > { %3202 = vmatprep.subr.mxu1 %v3536_v46 }
 0xb4e   : > { %v2082_v23 = vpop.f32.mrf.mxu0 }
 0xb4f   : > { %3188 = vmatmul.mubr.msk.f32.vlgmr.msra.gmra.mxu0 %vm893_vm5, %v2082_v23 }
 0xb50   : > { %v3178_v27 = vpop.f32.mrf.mxu0  ;;  %3190 = vmatprep.mubr.msk.f32.mxu0 %vm3537_vm4, %v3536_v46 }
 0xb51   : > { %v2247_v27 = vrot.slane %v4130_v25, %v2246_v17 }
 0xb52   : > { %v2087_v28 = vpop.f32.mrf.mxu1 }
 0xb53   : > { %3191 = vmatmul.mubr.msk.f32.gmra.mxu0 %vm893_vm5, %v2087_v28 }
 0xb54   : > { %v3181_v29 = vpop.f32.mrf.mxu1  ;;  %3193 = vmatprep.mubr.msk.f32.mxu0 %vm3537_vm4, %v3536_v46 }
 0xb56   : > { %v2092_v30 = vpop.f32.mrf.mxu1 }
 0xb57   : > { %3194 = vmatmul.mubr.msk.f32.gmra.mxu0 %vm893_vm5, %v2092_v30 }
 0xb58   : > { %v3184_v31 = vpop.f32.mrf.mxu1  ;;  %3229 = vmatprep.mubr.msk.f32.mxu0 %vm3537_vm4, %v3536_v46 }
 0xc0f   : > { %v2171_v33 = vpop.f32.mrf.mxu0 }
 0xc10   : > { %v2185_v34 = vadd.f32 %v2171_v33, %v4058_v56 }
 0xc11   : > { %v3189_v37 = vpop.f32.mrf.mxu0 }
 0xc12   : > { %v2188_v41 = vadd.f32 %v3434_v40, %v2185_v34 }
 0xc13   : > { %v2176_v43 = vpop.f32.mrf.mxu0 }
 0xc14   : > { %v4100_v44 = vadd.f32 %v2194_v36, %v2188_v41  ;;  %v2186_v45 = vadd.f32 %v2176_v43, %v4061_v59  ;;  %v2439_v41 = vld [vmem:[%s3744_s25 + $0x38] sm:$0xff]  ;;  %v2438_v43 = vld [vmem:[%s3744_s25 + $0x30] sm:$0xff] }
 0xc15   : > { %v3192_v47 = vpop.f32.mrf.mxu0  ;;  %3214 = vmatpush3.msra.mxu0 %v2439_v41 }
 0xc16   : > { %v2189_v49 = vadd.f32 %v3435_v48, %v2186_v45  ;;  %v2198_v50 = vsel %vm718_vm3, %v4100_v44, 0.0  ;;  %3215 = vmatprep.subr.mxu0 %v3536_v46  ;;  %v2437_v45 = vld [vmem:[%s3744_s25 + $0x28] sm:$0xff]  ;;  %v2436_v47 = vld [vmem:[%s3744_s25 + $0x20] sm:$0xff]  ;;  %v2435_v48 = vld [vmem:[%s3744_s25 + $0x18] sm:$0xff] }
 0xc17   : > { %2199 = vadd.xlane.f32.xlu1 %v2198_v50  ;;  %v2181_v51 = vpop.f32.mrf.mxu0  ;;  %3216 = vmatpush3.msra.mxu0 %v2438_v43  ;;  %v2433_v50 = vld [vmem:[%s3744_s25 + $0x8] sm:$0xff] }
 0xc18   : > { %v4105_v52 = vadd.f32 %v2194_v36, %v2189_v49  ;;  %v2187_v62 = vadd.f32 %v2181_v51, %v4069_v11  ;;  %v2251_v11 = vld [vmem:[%s3734_s26] sm:$0xff]  ;;  %3217 = vmatprep.subr.mxu0 %v3536_v46  ;;  %v2434_v49 = vld [vmem:[%s3744_s25 + $0x10] sm:$0xff] }
 0xc19   : > { %v3195_v53 = vpop.f32.mrf.mxu0  ;;  %3203 = vmatpush3.msra.mxu1 %v2251_v11  ;;  %3218 = vmatpush3.msra.mxu0 %v2437_v45  ;;  %v2432_v51 = vld [vmem:[%s3744_s25] sm:$0xff] }
 0xc1a   : > { %v2190_v55 = vadd.f32 %v3436_v54, %v2187_v62  ;;  %v2201_v56 = vsel %vm718_vm3, %v4105_v52, 0.0  ;;  %3219 = vmatprep.subr.mxu0 %v3536_v46  ;;  %v2869_v62 = vld [vmem:[%s596_s20] ss:$0 sm:$0xff] }
 0xc1b   : > { %2202 = vadd.xlane.f32.xlu0 %v2201_v56  ;;  %3220 = vmatpush3.msra.mxu0 %v2436_v47 }
 0xc1c   : > { %v4110_v57 = vadd.f32 %v2194_v36, %v2190_v55  ;;  %3221 = vmatprep.subr.mxu0 %v3536_v46 }
 0xc1d   : > { %3222 = vmatpush3.msra.mxu0 %v2435_v48 }
 0xc1e   : > { %v2204_v58 = vsel %vm718_vm3, %v4110_v57, 0.0  ;;  %3223 = vmatprep.subr.mxu0 %v3536_v46 }
 0xc1f   : > { %2205 = vadd.xlane.f32.xlu0 %v2204_v58  ;;  %3224 = vmatpush3.msra.mxu0 %v2434_v49 }
 0xc20   : > { %3225 = vmatprep.subr.mxu0 %v3536_v46 }
 0xc21   : > { %3226 = vmatpush3.msra.mxu0 %v2433_v50 }
 0xc22   : > { %3227 = vmatprep.subr.mxu0 %v3536_v46 }
 0xc23   : > { %3228 = vmatpush3.msra.mxu0 %v2432_v51 }
 0xca0   : > { %v2200_v59 = vpop.xlane.xlu1 %2199 }
 0xca1   : > { %v2207_v61 = vmul.f32 0.03125, %v2200_v59 }
 0xca3   : > { %v2210_v63 = vsub.f32 %v4100_v44, %v2207_v61 }
 0xca4   : > { %v2203_v0 = vpop.xlane.xlu0 %2202 }
 0xca5   : > { %v2208_v38 = vmul.f32 0.03125, %v2203_v0  ;;  %v2213_v1 = vmul.f32 %v2210_v63, %v2210_v63 }
 0xca7   : > { %v2211_v2 = vsub.f32 %v4105_v52, %v2208_v38  ;;  %v2216_v3 = vsel %vm718_vm3, %v2213_v1, 0.0 }
 0xca8   : > { %2217 = vadd.xlane.f32.xlu0 %v2216_v3  ;;  %v2206_v4 = vpop.xlane.xlu0 %2205 }
 0xca9   : > { %v2209_v18 = vmul.f32 0.03125, %v2206_v4  ;;  %v2214_v5 = vmul.f32 %v2211_v2, %v2211_v2 }
 0xcab   : > { %v2212_v35 = vsub.f32 %v4110_v57, %v2209_v18  ;;  %v2219_v6 = vsel %vm718_vm3, %v2214_v5, 0.0 }
 0xcac   : > { %2220 = vadd.xlane.f32.xlu1 %v2219_v6 }
 0xcad   : > { %v2215_v7 = vmul.f32 %v2212_v35, %v2212_v35 }
 0xcaf   : > { %v2222_v39 = vsel %vm718_vm3, %v2215_v7, 0.0 }
 0xcb0   : > { %2223 = vadd.xlane.f32.xlu0 %v2222_v39 }
 0xd31   : > { %v2218_v12 = vpop.xlane.xlu0 %2217 }
 0xd32   : > { %v2225_v24 = vmul.f32 0.03125, %v2218_v12 }
 0xd34   : > { %v2228_v13 = vadd.f32 1e-05, %v2225_v24 }
 0xd35   : > { %v2221_v14 = vpop.xlane.xlu1 %2220 }
 0xd36   : > { %3416 = vrsqrt.f32 %v2228_v13  ;;  %v2226_v15 = vmul.f32 0.03125, %v2221_v14 }
 0xd38   : > { %v2229_v26 = vadd.f32 1e-05, %v2226_v15 }
 0xd39   : > { %v2224_v21 = vpop.xlane.xlu0 %2223 }
 0xd3a   : > { %3418 = vrsqrt.f32 %v2229_v26  ;;  %v2227_v22 = vmul.f32 0.03125, %v2224_v21 }
 0xd3c   : > { %v2230_v42 = vadd.f32 1e-05, %v2227_v22 }
 0xd3e   : > { %3420 = vrsqrt.f32 %v2230_v42 }
 0xd43   : > { %v3417_v20 = vpop.eup %3416 }
 0xd44   : > { %v2234_v23 = vmul.f32 %v3417_v20, %v2210_v63 }
 0xd46   : > { %v2241_v28 = vmul.f32 %v2240_v19, %v2234_v23 }
 0xd47   : > { %v3419_v29 = vpop.eup %3418 }
 0xd48   : > { %v2248_v30 = vadd.f32 %v2247_v27, %v2241_v28  ;;  %v2235_v31 = vmul.f32 %v3419_v29, %v2211_v2 }
 0xd4a   : > { %3205 = vmatmul.mubr.msk.f32.vlgmr.msra.gmra.mxu1 %vm718_vm3, %v2248_v30  ;;  %v2242_v32 = vmul.f32 %v2240_v19, %v2235_v31 }
 0xd4b   : > { %v3421_v33 = vpop.eup %3420  ;;  %3207 = vmatprep.mubr.msk.f32.mxu1 %vm3537_vm4, %v3536_v46 }
 0xd4c   : > { %v2249_v34 = vadd.f32 %v2247_v27, %v2242_v32  ;;  %v2236_v36 = vmul.f32 %v3421_v33, %v2212_v35 }
 0xd4e   : > { %3208 = vmatmul.mubr.msk.f32.gmra.mxu1 %vm718_vm3, %v2249_v34  ;;  %v2243_v37 = vmul.f32 %v2240_v19, %v2236_v36 }
 0xd4f   : > { %3210 = vmatprep.mubr.msk.f32.mxu1 %vm3537_vm4, %v3536_v46 }
 0xd50   : > { %v2250_v40 = vadd.f32 %v2247_v27, %v2243_v37 }
 0xd52   : > { %3211 = vmatmul.mubr.msk.f32.gmra.mxu1 %vm718_vm3, %v2250_v40 }
 0xe0a   : > { %v2337_v53 = vpop.f32.mrf.mxu1 }
 0xe0b   : > { %v4161_v54 = vadd.f32 %v2869_v62, %v2337_v53 }
 0xe0c   : > { %v3206_v55 = vpop.f32.mrf.mxu1 }
 0xe0d   : > { %v4164_v56 = vmul.f32 0.70710677, %v4161_v54 }
 0xe0e   : > { %v2342_v58 = vpop.f32.mrf.mxu1 }
 0xe0f   : > { %v2363_v59 = vand.u32 2147483647, %v4164_v56  ;;  %v4167_v61 = vadd.f32 %v2869_v62, %v2342_v58  ;;  %vm2357_vm8 = vcmp.ge.f32.partialorder %v4164_v56, 0.0 }
 0xe10   : > { %v3209_v63 = vpop.f32.mrf.mxu1 }
 0xe11   : > { %v2366_v0 = vmul.f32 0.3275911, %v2363_v59  ;;  %v4170_v38 = vmul.f32 0.70710677, %v4167_v61  ;;  %v2405_v8 = vsub.f32 0.0, %v2363_v59 }
 0xe12   : > { %v2347_v1 = vpop.f32.mrf.mxu1 }
 0xe13   : > { %v2369_v2 = vadd.f32 1.0, %v2366_v0  ;;  %v2364_v3 = vand.u32 2147483647, %v4170_v38  ;;  %v4173_v4 = vadd.f32 %v2869_v62, %v2347_v1  ;;  %v2408_v10 = vmul.f32 %v2405_v8, %v2363_v59 }
 0xe14   : > { %v3212_v18 = vpop.f32.mrf.mxu1  ;;  %v3550_v59 = vmov -1.0   ;;  %vm2358_vm9 = vcmp.ge.f32.partialorder %v4170_v38, 0.0 }
 0xe15   : > { %3422 = vrcp.f32 %v2369_v2  ;;  %v2367_v5 = vmul.f32 0.3275911, %v2364_v3  ;;  %v4176_v35 = vmul.f32 0.70710677, %v4173_v4  ;;  %v2406_v11 = vsub.f32 0.0, %v2364_v3 }
 0xe16   : > { %v2411_v13 = vmul.f32 1.442695, %v2408_v10  ;;  %v2360_v63 = vsel %vm2357_vm8, 1.0, %v3550_v59  ;;  %v2351_v18 = vmul.f32 0.5, %v4161_v54 }
 0xe17   : > { %v2370_v6 = vadd.f32 1.0, %v2367_v5  ;;  %v2365_v7 = vand.u32 2147483647, %v4176_v35  ;;  %v2409_v14 = vmul.f32 %v2406_v11, %v2364_v3  ;;  %vm2359_vm11 = vcmp.ge.f32.partialorder %v4176_v35, 0.0 }
 0xe18   : > { %v2352_v11 = vmul.f32 0.5, %v4167_v61  ;;  %v2442_v61 = vsub.s32 5, %v3808_v60 }
 0xe19   : > { %3424 = vrcp.f32 %v2370_v6  ;;  %v2368_v39 = vmul.f32 0.3275911, %v2365_v7  ;;  %v2407_v15 = vsub.f32 0.0, %v2365_v7  ;;  %v2413_v16 = vmul.f32 1.442695, %v2409_v14 }
 0xe1a   : > { %v2353_v14 = vmul.f32 0.5, %v4173_v4 }
 0xe1b   : > { %v2371_v9 = vadd.f32 1.0, %v2368_v39  ;;  %v2410_v17 = vmul.f32 %v2407_v15, %v2365_v7  ;;  %v2361_v7 = vsel %vm2358_vm9, 1.0, %v3550_v59 }
 0xe1d   : > { %3426 = vrcp.f32 %v2371_v9  ;;  %v2415_v30 = vmul.f32 1.442695, %v2410_v17 }
 0xe1e   : > { %3428 = vpow2.f32 %v2411_v13 }
 0xe1f   : > { %3430 = vpow2.f32 %v2413_v16 }
 0xe20   : > { %3432 = vpow2.f32 %v2415_v30 }
 0xe22   : > { %v3423_v12 = vpop.eup %3422 }
 0xe23   : > { %v2378_v24 = vmul.f32 1.0614054, %v3423_v12 }
 0xe25   : > { %v2381_v26 = vadd.f32 -1.4531521, %v2378_v24  ;;  %v2362_v24 = vsel %vm2359_vm11, 1.0, %v3550_v59 }
 0xe26   : > { %v3425_v21 = vpop.eup %3424 }
 0xe27   : > { %v2384_v22 = vmul.f32 %v3423_v12, %v2381_v26  ;;  %v2379_v42 = vmul.f32 1.0614054, %v3425_v21  ;;  %v2443_v26 = vrot.slane %v4130_v25, %v2442_v61 }
 0xe29   : > { %v2387_v19 = vadd.f32 1.4214138, %v2384_v22  ;;  %v2382_v20 = vadd.f32 -1.4531521, %v2379_v42 }
 0xe2a   : > { %v3427_v23 = vpop.eup %3426 }
 0xe2b   : > { %v2390_v27 = vmul.f32 %v3423_v12, %v2387_v19  ;;  %v2385_v28 = vmul.f32 %v3425_v21, %v2382_v20  ;;  %v2380_v29 = vmul.f32 1.0614054, %v3427_v23  ;;  %v3429_v48 = vpop.eup %3428 }
 0xe2c   : > { %v3431_v58 = vpop.eup %3430 }
 0xe2d   : > { %v2393_v31 = vadd.f32 -0.28449672, %v2390_v27  ;;  %v2388_v32 = vadd.f32 1.4214138, %v2385_v28  ;;  %v2383_v33 = vadd.f32 -1.4531521, %v2380_v29  ;;  %v3433_v39 = vpop.eup %3432 }
 0xe2f   : > { %v2396_v34 = vmul.f32 %v3423_v12, %v2393_v31  ;;  %v2391_v36 = vmul.f32 %v3425_v21, %v2388_v32  ;;  %v2386_v37 = vmul.f32 %v3427_v23, %v2383_v33 }
 0xe31   : > { %v2399_v40 = vadd.f32 0.2548296, %v2396_v34  ;;  %v2394_v41 = vadd.f32 -0.28449672, %v2391_v36  ;;  %v2389_v43 = vadd.f32 1.4214138, %v2386_v37 }
 0xe33   : > { %v2402_v45 = vmul.f32 %v3423_v12, %v2399_v40  ;;  %v2397_v47 = vmul.f32 %v3425_v21, %v2394_v41  ;;  %v2392_v49 = vmul.f32 %v3427_v23, %v2389_v43 }
 0xe35   : > { %v2417_v50 = vmul.f32 %v3429_v48, %v2402_v45  ;;  %v2400_v51 = vadd.f32 0.2548296, %v2397_v47  ;;  %v2395_v62 = vadd.f32 -0.28449672, %v2392_v49 }
 0xe37   : > { %v2420_v53 = vsub.f32 1.0, %v2417_v50  ;;  %v2403_v55 = vmul.f32 %v3425_v21, %v2400_v51  ;;  %v2398_v0 = vmul.f32 %v3427_v23, %v2395_v62 }
 0xe39   : > { %v2423_v1 = vmul.f32 %v2420_v53, %v2360_v63  ;;  %v2418_v2 = vmul.f32 %v3431_v58, %v2403_v55  ;;  %v2401_v3 = vadd.f32 0.2548296, %v2398_v0 }
 0xe3b   : > { %v2426_v5 = vadd.f32 1.0, %v2423_v1  ;;  %v2421_v6 = vsub.f32 1.0, %v2418_v2  ;;  %v2404_v56 = vmul.f32 %v3427_v23, %v2401_v3 }
 0xe3d   : > { %v2429_v8 = vmul.f32 %v2426_v5, %v2351_v18  ;;  %v2424_v9 = vmul.f32 %v2421_v6, %v2361_v7  ;;  %v2419_v10 = vmul.f32 %v3433_v39, %v2404_v56 }
 0xe3f   : > { %v2427_v12 = vadd.f32 1.0, %v2424_v9  ;;  %3230 = vmatmul.mubr.msk.f32.vlgmr.msra.gmra.mxu0 %vm2444_vm10, %v2429_v8  ;;  %v2422_v38 = vsub.f32 1.0, %v2419_v10 }
 0xe40   : > { %3232 = vmatprep.mubr.msk.f32.mxu0 %vm3537_vm4, %v3536_v46 }
 0xe41   : > { %v2430_v54 = vmul.f32 %v2427_v12, %v2352_v11  ;;  %v2425_v13 = vmul.f32 %v2422_v38, %v2362_v24 }
 0xe43   : > { %3233 = vmatmul.mubr.msk.f32.gmra.mxu0 %vm2444_vm10, %v2430_v54  ;;  %v2428_v15 = vadd.f32 1.0, %v2425_v13 }
 0xe44   : > { %3235 = vmatprep.mubr.msk.f32.mxu0 %vm3537_vm4, %v3536_v46 }
 0xe45   : > { %v2431_v35 = vmul.f32 %v2428_v15, %v2353_v14 }
 0xe47   : > { %3236 = vmatmul.mubr.msk.f32.gmra.mxu0 %vm2444_vm10, %v2431_v35 }
 0xeff   : > { %v2520_v21 = vpop.f32.mrf.mxu0 }
 0xf00   : > { %v2521_v22 = vadd.f32 %v2520_v21, %v2443_v26 }
 0xf01   : > { %v3231_v42 = vpop.f32.mrf.mxu0 }
 0xf02   : > { %v2534_v16 = vadd.f32 %v2521_v22, %v4100_v44 }
 0xf03   : > { %v2525_v17 = vpop.f32.mrf.mxu0 }
 0xf04   : > { %2537 = vst.msk [vmem:[#allocation2] sm:$0xff] %vm718_vm3, %v2534_v16  ;;  %v2526_v4 = vadd.f32 %v2525_v17, %v2443_v26 }
 0xf05   : > { %v3234_v19 = vpop.f32.mrf.mxu0 }
 0xf06   : > { %v2535_v20 = vadd.f32 %v2526_v4, %v4105_v52 }
 0xf07   : > { %v2530_v46 = vpop.f32.mrf.mxu0 }
 0xf08   : > { %2538 = vst.msk [vmem:[#allocation2 + $0x8] sm:$0xff] %vm718_vm3, %v2535_v20  ;;  %v2531_v23 = vadd.f32 %v2530_v46, %v2443_v26  ;;  %2543 = sbr.rel (%p2876_p1) target bundleno = 4358 (0x1106), region = 84 }
 0xf09   : > { %v3237_v27 = vpop.f32.mrf.mxu0 }
 0xf0a   : > { %v2536_v60 = vadd.f32 %v2531_v23, %v4110_v57 }
 0xf0c   : > { %2539 = vst.msk [vmem:[#allocation2 + $0x10] sm:$0xff] %vm718_vm3, %v2536_v60 }
 0xf0d   : > { %vm2546_vm12 = vcmask 253952   ;;  %v2565_v31 = vld [vmem:[%s4283_s12 + $0x18] sm:$0xff]  ;;  %v3551_v32 = vmov 0.0   ;;  %v2564_v57 = vld [vmem:[%s4283_s12 + $0x10] sm:$0xff]  ;;  %vm3552_vm13 = vmmov 0   ;;  %v2563_v33 = vld [vmem:[%s4283_s12 + $0x8] sm:$0xff] }
 0xf0e   : > { %v2547_v44 = vsel %vm2546_vm12, %v2534_v16, 0.0  ;;  %3238 = vmatprep.subr.mxu0 %v3551_v32  ;;  %3246 = vmatprep.mubr.msk.f32.mxu0 %vm3552_vm13, %v3551_v32  ;;  %v2562_v34 = vld [vmem:[%s4283_s12] sm:$0xff] }
 0xf0f   : > { %2548 = vadd.xlane.f32.xlu0 %v2547_v44  ;;  %3239 = vmatpush3.msra.mxu0 %v2565_v31  ;;  %v2544_v43 = vld [vmem:[%s4323_s11] sm:$0x1] }
 0xf10   : > { %3240 = vmatprep.subr.mxu0 %v3551_v32  ;;  %v2545_v47 = vld [vmem:[%s4324_s0] sm:$0x1] }
 0xf11   : > { %3241 = vmatpush3.msra.mxu0 %v2564_v57  ;;  %v2566_v50 = vld [vmem:[%s4325_s24] sm:$0x1] }
 0xf12   : > { %3242 = vmatprep.subr.mxu0 %v3551_v32 }
 0xf13   : > { %3243 = vmatpush3.msra.mxu0 %v2563_v33 }
 0xf14   : > { %3244 = vmatprep.subr.mxu0 %v3551_v32 }
 0xf15   : > { %3245 = vmatpush3.msra.mxu0 %v2562_v34 }
 0xf98   : > { %v2549_v25 = vpop.xlane.xlu0 %2548 }
 0xf99   : > { %v2550_v28 = vmul.f32 0.03125, %v2549_v25 }
 0xf9b   : > { %v2551_v29 = vsub.f32 %v2534_v16, %v2550_v28 }
 0xf9d   : > { %v2552_v30 = vmul.f32 %v2551_v29, %v2551_v29 }
 0xf9f   : > { %v2553_v52 = vsel %vm2546_vm12, %v2552_v30, 0.0 }
 0xfa0   : > { %2554 = vadd.xlane.f32.xlu0 %v2553_v52 }
0x1029   : > { %v2555_v36 = vpop.xlane.xlu0 %2554 }
0x102a   : > { %v2556_v37 = vmul.f32 0.03125, %v2555_v36 }
0x102c   : > { %v2557_v40 = vadd.f32 1e-05, %v2556_v37 }
0x102e   : > { %3438 = vrsqrt.f32 %v2557_v40 }
0x103b   : > { %v3439_v41 = vpop.eup %3438 }
0x103c   : > { %v2559_v45 = vmul.f32 %v3439_v41, %v2551_v29 }
0x103e   : > { %v2560_v48 = vmul.f32 %v2559_v45, %v2544_v43 }
0x1040   : > { %v2561_v49 = vadd.f32 %v2560_v48, %v2545_v47 }
0x1042   : > { %3247 = vmatmul.mubr.msk.f32.vlgmr.msra.gmra.mxu0 %vm718_vm3, %v2561_v49 }
0x1102   : > { %v2636_v51 = vpop.f32.mrf.mxu0 }
0x1103   : > { %v2637_v62 = vadd.f32 %v2636_v51, %v2566_v50 }
0x1104   : > { %v3248_v53 = vpop.f32.mrf.mxu0 }
0x1105   : > { %2640 = vst [vmem:[%s3748_s5] sm:$0x1] %v2637_v62 }
0x1106 PF: > { %s4326_s15 = sld [smem:[#allocation8_spill]]  ;;  %s2654_s25 = sshll.u32 %s3748_s5, 4  ;;  %s2655_s25 = int_to_ptr.vmem [resolvable:$true] %s2654_s25 }
0x1107   : > { %s4328_s26 = sld [smem:[#allocation23_spill]]  ;;  %s4329_s16 = sand.u32 1, %s3508_s30  }
0x1108   : > { %s2642_s14 = scalar_lea.sflag [#allocation4], %s4329_s16  ;;  %s3440_s22 = scalar_lea.vmem %s2655_s25, 16 }
0x1109   : > { %p3441_p2 = scmp.ne.s32.totalorder %s2655_s25, %s3440_s22  ;;  %s3553_s29 = smov [#allocation3]  }
0x110a   : > { %s3444_s17 = sshll.u32 %s3553_s29, 4  ;;  %s3445_s17 = int_to_ptr.vmem [resolvable:$false] %s3444_s17 }
0x110b   : > { %p3442_p4 = pnand %p3441_p2, %p3678_p3  ;;  %s3446_s10 = scalar_lea.vmem %s3445_s17, 32 }
0x110c   : > { %s2878_s13 = sshll.u32 %s4326_s15, 4  ;;  %p3447_p6 = scmp.lt.s32.totalorder %s2655_s25, %s3445_s17 }
0x110d   : > { %s2652_s20 = scalar_lea.hbm %s4328_s26, %s2878_s13  ;;  %p3443_p5 = pneg %p3442_p4 }
0x110e   : > { %p3448_p7 = scmp.lt.s32.totalorder %s3446_s10, %s3440_s22 }
0x1110   : > { %p3449_p8 = por %p3448_p7, %p3447_p6 }
0x1112   : > { %p3450_p10 = pnand %p3449_p8, %p3443_p5 }
0x1114   : > { %3453 = shalt.err (!%p3450_p10)
}
0x1115   : > { %s3454_s11 = scalar_lea.hbm %s2652_s20, 16  ;;  %s3458_s23 = scalar_lea.hbm %s4328_s26, 32 }
0x1116   : > { %p3455_p11 = scmp.ne.s32.totalorder %s2652_s20, %s3454_s11  ;;  %p3459_p0 = scmp.lt.s32.totalorder %s2652_s20, %s4328_s26 }
0x1117   : > { %p3460_p1 = scmp.lt.s32.totalorder %s3458_s23, %s3454_s11 }
0x1118   : > { %p3456_p12 = pnand %p3455_p11, %p3678_p3 }
0x1119   : > { %p3461_p2 = por %p3460_p1, %p3459_p0 }
0x111a   : > { %p3457_p13 = pneg %p3456_p12 }
0x111c   : > { %p3462_p4 = pnand %p3461_p2, %p3457_p13 }
0x111e   : > { %3465 = shalt.err (!%p3462_p4)
}
0x111f   : > { %3272 = dma.vmem_to_hbm [thread:$0]  (%p3678_p3), %s2655_s25, 16, %s2652_s20, %s2642_s14  }
0x1120 PF: > { %s4330_s21 = sld [smem:[#allocation11_spill]] }
0x1121   : > { %s4331_s24 = sld [smem:[#allocation6_spill]] }
0x1126   : > { %p3278_p5 = scmp.ge.s32.totalorder %s4330_s21, 2 }
0x1127   : > { %s2666_s13 = sand.u32 1, %s4331_s24  }
0x1128   : > { %p3275_p6 = pnand %p3278_p5, %p3688_p9  ;;  %s2667_s19 = scalar_lea.sflag [#allocation4], %s2666_s13 }
0x112a   : > { %p3276_p7 = pneg %p3275_p6 }
0x112c   : > { %3499 = dma.done.wait (%p3276_p7), %s2667_s19, 16  }
0x112d   : > { %3501 = vsyncadd (%p3276_p7), %s2667_s19, 4294967280  ;;  %s27_s20 = sadd.s32 1, %s4330_s21   ;;  %s4333_s18 = sld [smem:[#allocation7_spill]] }
0x112e   : > { %p24_p8 = scmp.ge.s32.totalorder %s27_s20, 6   ;;  %s4334_s15 = sld [smem:[#allocation16_spill]] }
0x112f   : > { %s4335_s16 = sld [smem:[#allocation9_spill]]  ;;  %s4339_s29 = smov %s3508_s30 }
0x1130   : > { %s4336_s17 = sld [smem:[#allocation10_spill]] }
0x1131   : > { %s4337_s27 = sld [smem:[#allocation12_spill]] }
0x1132   : > { %s4338_s19 = sld [smem:[#allocation14_spill]] }
0x1133   : > { %s4340_s30 = smov %s4333_s18  ;;  %26 = sbr.rel (!%p24_p8) target bundleno = 13 (0xd), region = 140 }
0x1137   : > { %s4341_s18 = smov %s4337_s27 }
0x1138   :  { %2671 = vsyncpa [#allocation4], 1 }
0x1139   :  { %2673 = vsyncpa [#allocation4 + $0x1], 1 }

</bundles_post_ra>
